<compile_context>
chip_gen: v6e
topology: v6e:2x2x1
jax: 0.10.0
libtpu: 0.0.40
codegen_flags: <defaults>
</compile_context>

<pallas_src>
import functools

import jax
import jax.numpy as jnp
from jax import lax
from jax.experimental import pallas as pl
from jax.experimental.pallas import tpu as pltpu


def _spot_matching_loss_kernel(
    rows_row_ref,   # VMEM (1, C_pad) i32   gt ref-patch indices (row layout)
    cols_row_ref,   # VMEM (1, C_pad) i32   gt src-patch indices (row layout)
    rows_col_ref,   # VMEM (C_pad, 1) i32   gt ref-patch indices (col layout, dedup only)
    cols_col_ref,   # VMEM (C_pad, 1) i32   gt src-patch indices (col layout, dedup only)
    vals_row_ref,   # VMEM (1, C_pad) f32   gt overlaps (padded with 0)
    coarse_ref,     # VMEM (M, N)           coarse matching scores
    ref_ov_ref,     # VMEM (M, 1)           predicted ref patch overlap
    src_ov_ref,     # VMEM (1, N)           predicted src patch overlap
    spot_ref,       # VMEM (TB, M, N)       one B-block of spot_matching_scores
    spot_out,       # SMEM (1, 1) f32
    coarse_out,     # SMEM (1, 1) f32
    r01t_s,         # VMEM scratch (M, C_pad) f32   one-hot rows (transposed layout)
    c01t_s,         # VMEM scratch (N, C_pad)       one-hot cols (transposed, gather dtype)
    w_s,            # VMEM scratch (1, C_pad) f32   pos_masks gathered at GT pairs
    g_s,            # VMEM scratch (TB, C_pad) f32  gathered spot scores of this block
    scal_s,         # SMEM scratch (4,) f32  [spot acc, 1/pos_sum, coarse_loss, -]
    *,
    positive_overlap: float,
    batch_size: int,
    inv_b: float,
):
    i = pl.program_id(0)
    M, N = coarse_ref.shape
    C_pad = rows_row_ref.shape[1]
    TB = spot_ref.shape[0]

    # ---------------- one-time setup on the first grid step ------------------
    @pl.when(i == 0)
    def _init():
        rows_row = rows_row_ref[...]                       # (1, C_pad)
        cols_row = cols_row_ref[...]
        rows_col = rows_col_ref[...]                       # (C_pad, 1)
        cols_col = cols_col_ref[...]
        vals_row = vals_row_ref[...].astype(jnp.float32)   # (1, C_pad)

        # "last write wins" dedup (matches torch assignment for duplicate pairs).
        eq = (rows_col == rows_row) & (cols_col == cols_row)          # (C_pad, C_pad)
        i_iota = lax.broadcasted_iota(jnp.int32, (C_pad, C_pad), 0)
        j_iota = lax.broadcasted_iota(jnp.int32, (C_pad, C_pad), 1)
        dup_later = jnp.max((eq & (i_iota > j_iota)).astype(jnp.float32),
                            axis=0, keepdims=True)                    # (1, C_pad)
        keep_row = (dup_later == 0.0).astype(jnp.float32)             # (1, C_pad)

        # One-hot gather matrices in transposed layout, built from the row
        # layouts (padded entries use index -1 -> all-zero columns).
        r01t = (lax.broadcasted_iota(jnp.int32, (M, C_pad), 0) == rows_row
                ).astype(jnp.float32)                                 # (M, C_pad)
        c01t = (lax.broadcasted_iota(jnp.int32, (N, C_pad), 0) == cols_row
                ).astype(jnp.float32)                                 # (N, C_pad)
        r01t_s[...] = r01t
        c01t_s[...] = c01t.astype(c01t_s.dtype)      # bf16 when spot scores are bf16

        # (C_pad, N) one-hot (from col layout) for the dense MXU scatter.
        c01 = (lax.broadcasted_iota(jnp.int32, (C_pad, N), 1) == cols_col
               ).astype(jnp.float32)

        # Dense overlaps via MXU scatter: (M, C_pad) @ (C_pad, N).
        overlaps = jnp.dot(r01t * (vals_row * keep_row), c01,
                           preferred_element_type=jnp.float32)        # (M, N)

        # pos_masks = overlaps * (pos & row-argmax-onehot & col-argmax-onehot)
        row_iota = lax.broadcasted_iota(jnp.int32, (M, N), 0)
        col_iota = lax.broadcasted_iota(jnp.int32, (M, N), 1)
        pos = overlaps > positive_overlap
        row_max = jnp.max(overlaps, axis=1, keepdims=True)
        first_col = jnp.min(jnp.where(overlaps == row_max, col_iota, N),
                            axis=1, keepdims=True)
        row_mask = col_iota == first_col
        col_max = jnp.max(overlaps, axis=0, keepdims=True)
        first_row = jnp.min(jnp.where(overlaps == col_max, row_iota, M),
                            axis=0, keepdims=True)
        col_mask = row_iota == first_row
        pos_masks = overlaps * (pos & row_mask & col_mask).astype(jnp.float32)

        pos_sum = jnp.sum(pos_masks)
        # NOTE: like the PyTorch reference, pos_sum == 0 yields inf/nan.
        inv_pos = 1.0 / pos_sum                      # exact (one-time scalar)

        # Sparse weights for both losses: w[c] = pos_masks[rows[c], cols[c]].
        u_w = jnp.dot(pos_masks, c01t, preferred_element_type=jnp.float32)  # (M, C_pad)
        w_row = jnp.sum(u_w * r01t, axis=0, keepdims=True) * keep_row       # (1, C_pad)
        w_s[...] = w_row

        # Coarse loss via the same sparse gather (~C_pad logs, not M*N).
        coarse_f32 = coarse_ref[...].astype(jnp.float32)
        u_c = jnp.dot(coarse_f32, c01t, preferred_element_type=jnp.float32)
        cvals = jnp.sum(u_c * r01t, axis=0, keepdims=True)                  # (1, C_pad)
        coarse_loss = jnp.sum(w_row * (-jnp.log(cvals + 1e-8))) * inv_pos

        # Patch-overlap (occlusion) losses.
        gt_ref = 1.0 - (jnp.sum(pos_masks, axis=1, keepdims=True) > 0.0
                        ).astype(jnp.float32)                                # (M, 1)
        gt_src = 1.0 - (jnp.sum(pos_masks, axis=0, keepdims=True) > 0.0
                        ).astype(jnp.float32)                                # (1, N)
        gt_ref = gt_ref / (jnp.sum(gt_ref) + 1e-8)
        gt_src = gt_src / (jnp.sum(gt_src) + 1e-8)
        ref_ov = ref_ov_ref[...].astype(jnp.float32)
        src_ov = src_ov_ref[...].astype(jnp.float32)
        coarse_loss = (coarse_loss
                       + jnp.sum(-jnp.log(1.0 - ref_ov + 1e-8) * gt_ref)
                       + jnp.sum(-jnp.log(1.0 - src_ov + 1e-8) * gt_src))

        scal_s[0] = 0.0          # spot-loss accumulator
        scal_s[1] = inv_pos
        scal_s[2] = coarse_loss

    # ----------- per-B-block sparse spot loss (lane-dense -log) --------------
    c01t_g = c01t_s[...]                                   # (N, C_pad), gather dtype
    r01t_g = r01t_s[...]                                   # (M, C_pad) f32
    for b in range(TB):                                    # static unroll over block
        sb = spot_ref[b].astype(c01t_g.dtype)              # (M, N), stays bf16 if bf16
        u = jnp.dot(sb, c01t_g, preferred_element_type=jnp.float32)   # (M, C_pad)
        # g[b, c] = spot[b, rows[c], cols[c]]  (exact one-hot gather)
        g_s[pl.ds(b, 1), :] = jnp.sum(u * r01t_g, axis=0, keepdims=True)

    # One lane-dense -log over the whole (TB, C_pad) block.
    b_iota = lax.broadcasted_iota(jnp.int32, (TB, C_pad), 0) + i * TB
    neg_log = -jnp.log(g_s[...] + 1e-8)                    # f32 epsilon + log
    contrib = jnp.sum(jnp.where(b_iota < batch_size, w_s[...] * neg_log, 0.0))
    scal_s[0] = scal_s[0] + contrib

    # ------------------------------ finalize ----------------------------------
    @pl.when(i == pl.num_programs(0) - 1)
    def _fin():
        spot_out[0, 0] = scal_s[0] * scal_s[1] * inv_b
        coarse_out[0, 0] = scal_s[2]


def spot_matching_loss(
    coarse_matching_scores,   # (M, N) f32/bf16
    spot_matching_scores,     # (B, M, N) f32/bf16
    gt_patch_corr_indices,    # (C, 2) int
    gt_patch_corr_overlaps,   # (C,)
    ref_patch_overlap,        # (M,)
    src_patch_overlap,        # (N,)
    *,
    positive_overlap: float = 0.1,
    block_b=None,             # override for the B-block size (testing / tuning)
):
    M, N = coarse_matching_scores.shape
    B = spot_matching_scores.shape[0]
    C = gt_patch_corr_indices.shape[0]

    # Pad the GT list to a lane/MXU friendly length; pads use index -1 (never hit).
    C_pad = max(128, ((C + 127) // 128) * 128)
    pad = C_pad - C
    rows = jnp.pad(gt_patch_corr_indices[:, 0].astype(jnp.int32), (0, pad),
                   constant_values=-1)
    cols = jnp.pad(gt_patch_corr_indices[:, 1].astype(jnp.int32), (0, pad),
                   constant_values=-1)
    vals = jnp.pad(gt_patch_corr_overlaps.astype(jnp.float32), (0, pad),
                   constant_values=0.0)

    # Gather matmul runs in the spot tensor's native dtype (bf16 MXU fast path).
    spot_dtype = jnp.dtype(spot_matching_scores.dtype)
    if spot_dtype in (jnp.dtype(jnp.bfloat16), jnp.dtype(jnp.float32)):
        gather_dtype = spot_dtype
    else:
        gather_dtype = jnp.dtype(jnp.float32)

    # ---- VMEM budget -> B-block size (v7x: 64 MiB, v5e/v6e: 128 MiB) --------
    try:
        vmem_cap = int(pltpu.get_tpu_info().vmem_capacity_bytes)
    except Exception:
        vmem_cap = 64 * 1024 * 1024          # conservative (v7x) fallback
    vmem_budget = vmem_cap * 3 // 4          # headroom for compiler internals

    itemsize = spot_dtype.itemsize
    coarse_itemsize = jnp.dtype(coarse_matching_scores.dtype).itemsize
    fixed_bytes = (
        2 * M * N * coarse_itemsize                           # coarse (double-buffered)
        + 2 * (M + N + 5 * C_pad) * 4 * 8                     # small padded inputs
        + M * C_pad * 4 + N * C_pad * gather_dtype.itemsize   # r01t_s / c01t_s scratch
        + 2 * M * C_pad * 4                                   # per-b matmul intermediate
        + 4 * C_pad * C_pad * 4                               # one-time dedup temporaries
        + 4 * M * N * 4)                                      # init overlaps / pos_masks
    spot_blk = M * N * itemsize
    if block_b is None:
        target = max(1, (vmem_budget - fixed_bytes) // (2 * spot_blk))
        target = int(min(target, 16, B))
    else:
        target = int(max(1, min(block_b, B)))
    # Snap to a divisor of B so every grid step sees a full block.
    tb = target
    while B % tb:
        tb -= 1
    grid_b = pl.cdiv(B, tb)

    kernel = functools.partial(
        _spot_matching_loss_kernel,
        positive_overlap=float(positive_overlap),
        batch_size=int(B),
        inv_b=1.0 / float(B),
    )

    grid_spec = pltpu.PrefetchScalarGridSpec(
        num_scalar_prefetch=0,
        grid=(grid_b,),
        in_specs=[
            pl.BlockSpec((1, C_pad), lambda i: (0, 0)),       # rows (row layout)
            pl.BlockSpec((1, C_pad), lambda i: (0, 0)),       # cols (row layout)
            pl.BlockSpec((C_pad, 1), lambda i: (0, 0)),       # rows (col layout)
            pl.BlockSpec((C_pad, 1), lambda i: (0, 0)),       # cols (col layout)
            pl.BlockSpec((1, C_pad), lambda i: (0, 0)),       # vals
            pl.BlockSpec((M, N), lambda i: (0, 0)),           # coarse scores
            pl.BlockSpec((M, 1), lambda i: (0, 0)),           # ref patch overlap
            pl.BlockSpec((1, N), lambda i: (0, 0)),           # src patch overlap
            pl.BlockSpec((tb, M, N), lambda i: (i, 0, 0)),    # spot scores (B-blocked)
        ],
        out_specs=(
            pl.BlockSpec((1, 1), lambda i: (0, 0),
                         memory_space=pltpu.MemorySpace.SMEM),
            pl.BlockSpec((1, 1), lambda i: (0, 0),
                         memory_space=pltpu.MemorySpace.SMEM),
        ),
        scratch_shapes=[
            pltpu.VMEM((M, C_pad), jnp.float32),     # r01t (f32 for VPU on v5e too)
            pltpu.VMEM((N, C_pad), gather_dtype),    # c01t (bf16 when spot is bf16)
            pltpu.VMEM((1, C_pad), jnp.float32),     # w
            pltpu.VMEM((tb, C_pad), jnp.float32),    # gathered block scores
            pltpu.SMEM((4,), jnp.float32),
        ],
    )

    # B axis carries scalar accumulators -> "arbitrary".
    # TODO(synk): v7x dual-TensorCore split of the B-block axis (per-core partials).
    spot_loss, coarse_loss = pl.pallas_call(
        kernel,
        grid_spec=grid_spec,
        out_shape=(
            jax.ShapeDtypeStruct((1, 1), jnp.float32),
            jax.ShapeDtypeStruct((1, 1), jnp.float32),
        ),
        compiler_params=pltpu.CompilerParams(
            dimension_semantics=("arbitrary",),
            vmem_limit_bytes=int(vmem_budget),
        ),
    )(
        rows.reshape(1, C_pad),
        cols.reshape(1, C_pad),
        rows.reshape(C_pad, 1),
        cols.reshape(C_pad, 1),
        vals.reshape(1, C_pad),
        coarse_matching_scores,
        ref_patch_overlap.reshape(M, 1),
        src_patch_overlap.reshape(1, N),
        spot_matching_scores,
    )
    return spot_loss[0, 0], coarse_loss[0, 0]


if __name__ == "__main__":
    key = jax.random.PRNGKey(0)
    k1, k2, k3, k4, k5, k6 = jax.random.split(key, 6)

    B, M, N, C = 12, 16, 16, 8

    # Matching scores in (0, 1) so log() is well defined (softmax-like outputs).
    coarse = jax.random.uniform(k1, (M, N), jnp.float32, 1e-3, 1.0)
    spot = jax.random.uniform(k2, (B, M, N), jnp.float32, 1e-3, 1.0).astype(jnp.bfloat16)

    # Ground-truth patch correspondences: unique (row, col) pairs, overlaps > threshold.
    gt_rows = jax.random.permutation(k3, jnp.arange(M, dtype=jnp.int32))[:C]
    gt_cols = jax.random.permutation(k4, jnp.arange(N, dtype=jnp.int32))[:C]
    gt_idx = jnp.stack([gt_rows, gt_cols], axis=1)
    gt_overlaps = jax.random.uniform(k5, (C,), jnp.float32, 0.3, 1.0)

    # Predicted per-patch overlap (occlusion) scores in [0, 1).
    ref_ov = jax.random.uniform(k6, (M,), jnp.float32, 0.0, 0.9)
    src_ov = jax.random.uniform(jax.random.fold_in(k6, 1), (N,), jnp.float32, 0.0, 0.9)

    # block_b=4 -> grid of 3 B-blocks: exercises init, cross-block accumulation,
    # and the finalize step of the pipelined kernel.
    loss, coarse_loss = spot_matching_loss(
        coarse, spot, gt_idx, gt_overlaps, ref_ov, src_ov,
        positive_overlap=0.1, block_b=4,
    )
    jax.block_until_ready((loss, coarse_loss))
    print("KERNEL_OK")
</pallas_src>

<mosaic_0001>
module attributes {stable_mosaic.version = 11 : i64} {
  func.func @_spot_matching_loss_kernel(%arg0: i32, %arg1: memref<1x128xi32, #tpu.memory_space<vmem>>, %arg2: memref<1x128xi32, #tpu.memory_space<vmem>>, %arg3: memref<128x1xi32, #tpu.memory_space<vmem>>, %arg4: memref<128x1xi32, #tpu.memory_space<vmem>>, %arg5: memref<1x128xf32, #tpu.memory_space<vmem>>, %arg6: memref<16x16xf32, #tpu.memory_space<vmem>>, %arg7: memref<16x1xf32, #tpu.memory_space<vmem>>, %arg8: memref<1x16xf32, #tpu.memory_space<vmem>>, %arg9: memref<4x16x16xbf16, #tpu.memory_space<vmem>>, %arg10: memref<1x1xf32, #tpu.memory_space<smem>>, %arg11: memref<1x1xf32, #tpu.memory_space<smem>>, %arg12: memref<16x128xf32, #tpu.memory_space<vmem>>, %arg13: memref<16x128xbf16, #tpu.memory_space<vmem>>, %arg14: memref<1x128xf32, #tpu.memory_space<vmem>>, %arg15: memref<4x128xf32, #tpu.memory_space<vmem>>, %arg16: memref<4xf32, #tpu.memory_space<smem>>) attributes {dimension_semantics = [#tpu.dimension_semantics<arbitrary>], iteration_bounds = array<i64: 3>, scalar_prefetch = 0 : i64, scratch_operands = 5 : i64, tpu.core_type = #tpu.core_type<tc>, window_params = [{pipeline_mode = #tpu.pipeline_mode<synchronous>, transform_indices = @transform_0, window_bounds = array<i64: 1, 128>}, {pipeline_mode = #tpu.pipeline_mode<synchronous>, transform_indices = @transform_1, window_bounds = array<i64: 1, 128>}, {pipeline_mode = #tpu.pipeline_mode<synchronous>, transform_indices = @transform_2, window_bounds = array<i64: 128, 1>}, {pipeline_mode = #tpu.pipeline_mode<synchronous>, transform_indices = @transform_3, window_bounds = array<i64: 128, 1>}, {pipeline_mode = #tpu.pipeline_mode<synchronous>, transform_indices = @transform_4, window_bounds = array<i64: 1, 128>}, {pipeline_mode = #tpu.pipeline_mode<synchronous>, transform_indices = @transform_5, window_bounds = array<i64: 16, 16>}, {pipeline_mode = #tpu.pipeline_mode<synchronous>, transform_indices = @transform_6, window_bounds = array<i64: 16, 1>}, {pipeline_mode = #tpu.pipeline_mode<synchronous>, transform_indices = @transform_7, window_bounds = array<i64: 1, 16>}, {transform_indices = @transform_8, window_bounds = array<i64: 4, 16, 16>}, {transform_indices = @transform_9, window_bounds = array<i64: 1, 1>}, {transform_indices = @transform_10, window_bounds = array<i64: 1, 1>}]} {
    %c0_i32 = arith.constant 0 : i32
    %0 = arith.cmpi eq, %arg0, %c0_i32 : i32
    %1 = arith.extui %0 : i1 to i32
    %c0_i32_0 = arith.constant 0 : i32
    %2 = arith.cmpi ne, %1, %c0_i32_0 : i32
    scf.if %2 {
      %c0_39 = arith.constant 0 : index
      %c0_40 = arith.constant 0 : index
      %60 = vector.load %arg1[%c0_39, %c0_40] : memref<1x128xi32, #tpu.memory_space<vmem>>, vector<1x128xi32>
      %c0_41 = arith.constant 0 : index
      %c0_42 = arith.constant 0 : index
      %61 = vector.load %arg2[%c0_41, %c0_42] : memref<1x128xi32, #tpu.memory_space<vmem>>, vector<1x128xi32>
      %c0_43 = arith.constant 0 : index
      %c0_44 = arith.constant 0 : index
      %62 = vector.load %arg3[%c0_43, %c0_44] : memref<128x1xi32, #tpu.memory_space<vmem>>, vector<128x1xi32>
      %c0_45 = arith.constant 0 : index
      %c0_46 = arith.constant 0 : index
      %63 = vector.load %arg4[%c0_45, %c0_46] : memref<128x1xi32, #tpu.memory_space<vmem>>, vector<128x1xi32>
      %c0_47 = arith.constant 0 : index
      %c0_48 = arith.constant 0 : index
      %64 = vector.load %arg5[%c0_47, %c0_48] : memref<1x128xf32, #tpu.memory_space<vmem>>, vector<1x128xf32>
      %65 = vector.broadcast %62 : vector<128x1xi32> to vector<128x128xi32>
      %66 = vector.broadcast %60 : vector<1x128xi32> to vector<128x128xi32>
      %67 = arith.cmpi eq, %65, %66 : vector<128x128xi32>
      %68 = vector.broadcast %63 : vector<128x1xi32> to vector<128x128xi32>
      %69 = vector.broadcast %61 : vector<1x128xi32> to vector<128x128xi32>
      %70 = arith.cmpi eq, %68, %69 : vector<128x128xi32>
      %71 = arith.andi %67, %70 : vector<128x128xi1>
      %72 = tpu.iota {dimensions = array<i32: 0>} : vector<128x128xi32>
      %73 = tpu.iota {dimensions = array<i32: 1>} : vector<128x128xi32>
      %74 = arith.cmpi sgt, %72, %73 : vector<128x128xi32>
      %75 = arith.andi %71, %74 : vector<128x128xi1>
      %76 = arith.extui %75 : vector<128x128xi1> to vector<128x128xi32>
      %77 = arith.sitofp %76 : vector<128x128xi32> to vector<128x128xf32>
      %cst_49 = arith.constant dense<0xFF800000> : vector<128xf32>
      %78 = vector.multi_reduction <maximumf>, %77, %cst_49 [0] : vector<128x128xf32> to vector<128xf32>
      %79 = vector.shape_cast %78 : vector<128xf32> to vector<1x128xf32>
      %cst_50 = arith.constant 0.000000e+00 : f32
      %80 = vector.broadcast %cst_50 : f32 to vector<1x128xf32>
      %81 = arith.cmpf oeq, %79, %80 : vector<1x128xf32>
      %82 = arith.extui %81 : vector<1x128xi1> to vector<1x128xi32>
      %83 = arith.sitofp %82 : vector<1x128xi32> to vector<1x128xf32>
      %84 = tpu.iota {dimensions = array<i32: 0>} : vector<16x128xi32>
      %85 = vector.broadcast %60 : vector<1x128xi32> to vector<16x128xi32>
      %86 = arith.cmpi eq, %84, %85 : vector<16x128xi32>
      %87 = arith.extui %86 : vector<16x128xi1> to vector<16x128xi32>
      %88 = arith.sitofp %87 : vector<16x128xi32> to vector<16x128xf32>
      %89 = tpu.iota {dimensions = array<i32: 0>} : vector<16x128xi32>
      %90 = vector.broadcast %61 : vector<1x128xi32> to vector<16x128xi32>
      %91 = arith.cmpi eq, %89, %90 : vector<16x128xi32>
      %92 = arith.extui %91 : vector<16x128xi1> to vector<16x128xi32>
      %93 = arith.sitofp %92 : vector<16x128xi32> to vector<16x128xf32>
      %c0_51 = arith.constant 0 : index
      %c0_52 = arith.constant 0 : index
      %94 = vector.load %arg12[%c0_51, %c0_52] : memref<16x128xf32, #tpu.memory_space<vmem>>, vector<16x128xf32>
      tpu.vector_store %arg12[%c0_51, %c0_52], %88 {strides = array<i32>} : memref<16x128xf32, #tpu.memory_space<vmem>>, vector<16x128xf32>,
      %95 = arith.truncf %93 : vector<16x128xf32> to vector<16x128xbf16>
      %c0_53 = arith.constant 0 : index
      %c0_54 = arith.constant 0 : index
      %96 = vector.load %arg13[%c0_53, %c0_54] : memref<16x128xbf16, #tpu.memory_space<vmem>>, vector<16x128xbf16>
      tpu.vector_store %arg13[%c0_53, %c0_54], %95 {strides = array<i32>} : memref<16x128xbf16, #tpu.memory_space<vmem>>, vector<16x128xbf16>,
      %97 = tpu.iota {dimensions = array<i32: 1>} : vector<128x16xi32>
      %98 = vector.broadcast %63 : vector<128x1xi32> to vector<128x16xi32>
      %99 = arith.cmpi eq, %97, %98 : vector<128x16xi32>
      %100 = arith.extui %99 : vector<128x16xi1> to vector<128x16xi32>
      %101 = arith.sitofp %100 : vector<128x16xi32> to vector<128x16xf32>
      %102 = arith.mulf %64, %83 : vector<1x128xf32>
      %103 = vector.broadcast %102 : vector<1x128xf32> to vector<16x128xf32>
      %104 = arith.mulf %88, %103 : vector<16x128xf32>
      %cst_55 = arith.constant dense<0.000000e+00> : vector<16x16xf32>
      %105 = tpu.matmul %104, %101, %cst_55 {dimension_numbers = #tpu.dot_dimension_numbers<[1], [0], [0], [1], [0, 0, 1, 1], [], []>} : vector<16x128xf32>, vector<128x16xf32>, vector<16x16xf32> -> vector<16x16xf32>
      %106 = tpu.iota {dimensions = array<i32: 0>} : vector<16x16xi32>
      %107 = tpu.iota {dimensions = array<i32: 1>} : vector<16x16xi32>
      %cst_56 = arith.constant 1.000000e-01 : f32
      %108 = vector.broadcast %cst_56 : f32 to vector<16x16xf32>
      %109 = arith.cmpf ogt, %105, %108 : vector<16x16xf32>
      %cst_57 = arith.constant dense<0xFF800000> : vector<16xf32>
      %110 = vector.multi_reduction <maximumf>, %105, %cst_57 [1] : vector<16x16xf32> to vector<16xf32>
      %111 = vector.shape_cast %110 : vector<16xf32> to vector<16x1xf32>
      %112 = vector.broadcast %111 : vector<16x1xf32> to vector<16x16xf32>
      %113 = arith.cmpf oeq, %105, %112 : vector<16x16xf32>
      %c16_i32 = arith.constant 16 : i32
      %114 = vector.broadcast %c16_i32 : i32 to vector<16x16xi32>
      %115 = arith.select %113, %107, %114 : vector<16x16xi1>, vector<16x16xi32>
      %cst_58 = arith.constant dense<2147483647> : vector<16xi32>
      %116 = vector.multi_reduction <minsi>, %115, %cst_58 [1] : vector<16x16xi32> to vector<16xi32>
      %117 = vector.shape_cast %116 : vector<16xi32> to vector<16x1xi32>
      %118 = vector.broadcast %117 : vector<16x1xi32> to vector<16x16xi32>
      %119 = arith.cmpi eq, %107, %118 : vector<16x16xi32>
      %cst_59 = arith.constant dense<0xFF800000> : vector<16xf32>
      %120 = vector.multi_reduction <maximumf>, %105, %cst_59 [0] : vector<16x16xf32> to vector<16xf32>
      %121 = vector.shape_cast %120 : vector<16xf32> to vector<1x16xf32>
      %122 = vector.broadcast %121 : vector<1x16xf32> to vector<16x16xf32>
      %123 = arith.cmpf oeq, %105, %122 : vector<16x16xf32>
      %c16_i32_60 = arith.constant 16 : i32
      %124 = vector.broadcast %c16_i32_60 : i32 to vector<16x16xi32>
      %125 = arith.select %123, %106, %124 : vector<16x16xi1>, vector<16x16xi32>
      %cst_61 = arith.constant dense<2147483647> : vector<16xi32>
      %126 = vector.multi_reduction <minsi>, %125, %cst_61 [0] : vector<16x16xi32> to vector<16xi32>
      %127 = vector.shape_cast %126 : vector<16xi32> to vector<1x16xi32>
      %128 = vector.broadcast %127 : vector<1x16xi32> to vector<16x16xi32>
      %129 = arith.cmpi eq, %106, %128 : vector<16x16xi32>
      %130 = arith.andi %109, %119 : vector<16x16xi1>
      %131 = arith.andi %130, %129 : vector<16x16xi1>
      %132 = arith.extui %131 : vector<16x16xi1> to vector<16x16xi32>
      %133 = arith.sitofp %132 : vector<16x16xi32> to vector<16x16xf32>
      %134 = arith.mulf %105, %133 : vector<16x16xf32>
      %135 = vector.shape_cast %134 : vector<16x16xf32> to vector<1x16x16xf32>
      %cst_62 = arith.constant dense<0.000000e+00> : vector<1xf32>
      %136 = vector.multi_reduction <add>, %135, %cst_62 [1, 2] : vector<1x16x16xf32> to vector<1xf32>
      %137 = vector.shape_cast %136 : vector<1xf32> to vector<1x1x1xf32>
      %138 = vector.extract %137[0, 0, 0] : f32 from vector<1x1x1xf32>
      %cst_63 = arith.constant 1.000000e+00 : f32
      %139 = arith.divf %cst_63, %138 : f32
      %cst_64 = arith.constant dense<0.000000e+00> : vector<16x128xf32>
      %140 = tpu.matmul %134, %93, %cst_64 {dimension_numbers = #tpu.dot_dimension_numbers<[1], [0], [0], [1], [0, 0, 1, 1], [], []>} : vector<16x16xf32>, vector<16x128xf32>, vector<16x128xf32> -> vector<16x128xf32>
      %141 = arith.mulf %140, %88 : vector<16x128xf32>
      %cst_65 = arith.constant dense<0.000000e+00> : vector<128xf32>
      %142 = vector.multi_reduction <add>, %141, %cst_65 [0] : vector<16x128xf32> to vector<128xf32>
      %143 = vector.shape_cast %142 : vector<128xf32> to vector<1x128xf32>
      %144 = arith.mulf %143, %83 : vector<1x128xf32>
      %c0_66 = arith.constant 0 : index
      %c0_67 = arith.constant 0 : index
      %145 = vector.load %arg14[%c0_66, %c0_67] : memref<1x128xf32, #tpu.memory_space<vmem>>, vector<1x128xf32>
      tpu.vector_store %arg14[%c0_66, %c0_67], %144 {strides = array<i32>} : memref<1x128xf32, #tpu.memory_space<vmem>>, vector<1x128xf32>,
      %c0_68 = arith.constant 0 : index
      %c0_69 = arith.constant 0 : index
      %146 = vector.load %arg6[%c0_68, %c0_69] : memref<16x16xf32, #tpu.memory_space<vmem>>, vector<16x16xf32>
      %cst_70 = arith.constant dense<0.000000e+00> : vector<16x128xf32>
      %147 = tpu.matmul %146, %93, %cst_70 {dimension_numbers = #tpu.dot_dimension_numbers<[1], [0], [0], [1], [0, 0, 1, 1], [], []>} : vector<16x16xf32>, vector<16x128xf32>, vector<16x128xf32> -> vector<16x128xf32>
      %148 = arith.mulf %147, %88 : vector<16x128xf32>
      %cst_71 = arith.constant dense<0.000000e+00> : vector<128xf32>
      %149 = vector.multi_reduction <add>, %148, %cst_71 [0] : vector<16x128xf32> to vector<128xf32>
      %150 = vector.shape_cast %149 : vector<128xf32> to vector<1x128xf32>
      %cst_72 = arith.constant 9.99999993E-9 : f32
      %151 = vector.broadcast %cst_72 : f32 to vector<1x128xf32>
      %152 = arith.addf %150, %151 : vector<1x128xf32>
      %153 = math.log %152 : vector<1x128xf32>
      %cst_73 = arith.constant 0.000000e+00 : f32
      %154 = vector.broadcast %cst_73 : f32 to vector<1x128xf32>
      %155 = arith.subf %154, %153 : vector<1x128xf32>
      %156 = arith.mulf %144, %155 : vector<1x128xf32>
      %157 = vector.shape_cast %156 : vector<1x128xf32> to vector<1x1x128xf32>
      %cst_74 = arith.constant dense<0.000000e+00> : vector<1xf32>
      %158 = vector.multi_reduction <add>, %157, %cst_74 [1, 2] : vector<1x1x128xf32> to vector<1xf32>
      %159 = vector.shape_cast %158 : vector<1xf32> to vector<1x1x1xf32>
      %160 = vector.extract %159[0, 0, 0] : f32 from vector<1x1x1xf32>
      %161 = arith.mulf %160, %139 : f32
      %cst_75 = arith.constant dense<0.000000e+00> : vector<16xf32>
      %162 = vector.multi_reduction <add>, %134, %cst_75 [1] : vector<16x16xf32> to vector<16xf32>
      %163 = vector.shape_cast %162 : vector<16xf32> to vector<16x1xf32>
      %cst_76 = arith.constant 0.000000e+00 : f32
      %164 = vector.broadcast %cst_76 : f32 to vector<16x1xf32>
      %165 = arith.cmpf ogt, %163, %164 : vector<16x1xf32>
      %166 = arith.extui %165 : vector<16x1xi1> to vector<16x1xi32>
      %167 = arith.sitofp %166 : vector<16x1xi32> to vector<16x1xf32>
      %cst_77 = arith.constant 1.000000e+00 : f32
      %168 = vector.broadcast %cst_77 : f32 to vector<16x1xf32>
      %169 = arith.subf %168, %167 : vector<16x1xf32>
      %cst_78 = arith.constant dense<0.000000e+00> : vector<16xf32>
      %170 = vector.multi_reduction <add>, %134, %cst_78 [0] : vector<16x16xf32> to vector<16xf32>
      %171 = vector.shape_cast %170 : vector<16xf32> to vector<1x16xf32>
      %cst_79 = arith.constant 0.000000e+00 : f32
      %172 = vector.broadcast %cst_79 : f32 to vector<1x16xf32>
      %173 = arith.cmpf ogt, %171, %172 : vector<1x16xf32>
      %174 = arith.extui %173 : vector<1x16xi1> to vector<1x16xi32>
      %175 = arith.sitofp %174 : vector<1x16xi32> to vector<1x16xf32>
      %cst_80 = arith.constant 1.000000e+00 : f32
      %176 = vector.broadcast %cst_80 : f32 to vector<1x16xf32>
      %177 = arith.subf %176, %175 : vector<1x16xf32>
      %178 = vector.shape_cast %169 : vector<16x1xf32> to vector<1x16x1xf32>
      %cst_81 = arith.constant dense<0.000000e+00> : vector<1xf32>
      %179 = vector.multi_reduction <add>, %178, %cst_81 [1, 2] : vector<1x16x1xf32> to vector<1xf32>
      %180 = vector.shape_cast %179 : vector<1xf32> to vector<1x1x1xf32>
      %181 = vector.extract %180[0, 0, 0] : f32 from vector<1x1x1xf32>
      %cst_82 = arith.constant 9.99999993E-9 : f32
      %182 = arith.addf %181, %cst_82 : f32
      %183 = vector.broadcast %182 : f32 to vector<16x1xf32>
      %184 = arith.divf %169, %183 : vector<16x1xf32>
      %185 = vector.shape_cast %177 : vector<1x16xf32> to vector<1x1x16xf32>
      %cst_83 = arith.constant dense<0.000000e+00> : vector<1xf32>
      %186 = vector.multi_reduction <add>, %185, %cst_83 [1, 2] : vector<1x1x16xf32> to vector<1xf32>
      %187 = vector.shape_cast %186 : vector<1xf32> to vector<1x1x1xf32>
      %188 = vector.extract %187[0, 0, 0] : f32 from vector<1x1x1xf32>
      %cst_84 = arith.constant 9.99999993E-9 : f32
      %189 = arith.addf %188, %cst_84 : f32
      %190 = vector.broadcast %189 : f32 to vector<1x16xf32>
      %191 = arith.divf %177, %190 : vector<1x16xf32>
      %c0_85 = arith.constant 0 : index
      %c0_86 = arith.constant 0 : index
      %192 = vector.load %arg7[%c0_85, %c0_86] : memref<16x1xf32, #tpu.memory_space<vmem>>, vector<16x1xf32>
      %c0_87 = arith.constant 0 : index
      %c0_88 = arith.constant 0 : index
      %193 = vector.load %arg8[%c0_87, %c0_88] : memref<1x16xf32, #tpu.memory_space<vmem>>, vector<1x16xf32>
      %cst_89 = arith.constant 1.000000e+00 : f32
      %194 = vector.broadcast %cst_89 : f32 to vector<16x1xf32>
      %195 = arith.subf %194, %192 : vector<16x1xf32>
      %cst_90 = arith.constant 9.99999993E-9 : f32
      %196 = vector.broadcast %cst_90 : f32 to vector<16x1xf32>
      %197 = arith.addf %195, %196 : vector<16x1xf32>
      %198 = math.log %197 : vector<16x1xf32>
      %cst_91 = arith.constant 0.000000e+00 : f32
      %199 = vector.broadcast %cst_91 : f32 to vector<16x1xf32>
      %200 = arith.subf %199, %198 : vector<16x1xf32>
      %201 = arith.mulf %200, %184 : vector<16x1xf32>
      %202 = vector.shape_cast %201 : vector<16x1xf32> to vector<1x16x1xf32>
      %cst_92 = arith.constant dense<0.000000e+00> : vector<1xf32>
      %203 = vector.multi_reduction <add>, %202, %cst_92 [1, 2] : vector<1x16x1xf32> to vector<1xf32>
      %204 = vector.shape_cast %203 : vector<1xf32> to vector<1x1x1xf32>
      %205 = vector.extract %204[0, 0, 0] : f32 from vector<1x1x1xf32>
      %206 = arith.addf %161, %205 : f32
      %cst_93 = arith.constant 1.000000e+00 : f32
      %207 = vector.broadcast %cst_93 : f32 to vector<1x16xf32>
      %208 = arith.subf %207, %193 : vector<1x16xf32>
      %cst_94 = arith.constant 9.99999993E-9 : f32
      %209 = vector.broadcast %cst_94 : f32 to vector<1x16xf32>
      %210 = arith.addf %208, %209 : vector<1x16xf32>
      %211 = math.log %210 : vector<1x16xf32>
      %cst_95 = arith.constant 0.000000e+00 : f32
      %212 = vector.broadcast %cst_95 : f32 to vector<1x16xf32>
      %213 = arith.subf %212, %211 : vector<1x16xf32>
      %214 = arith.mulf %213, %191 : vector<1x16xf32>
      %215 = vector.shape_cast %214 : vector<1x16xf32> to vector<1x1x16xf32>
      %cst_96 = arith.constant dense<0.000000e+00> : vector<1xf32>
      %216 = vector.multi_reduction <add>, %215, %cst_96 [1, 2] : vector<1x1x16xf32> to vector<1xf32>
      %217 = vector.shape_cast %216 : vector<1xf32> to vector<1x1x1xf32>
      %218 = vector.extract %217[0, 0, 0] : f32 from vector<1x1x1xf32>
      %219 = arith.addf %206, %218 : f32
      %cst_97 = arith.constant 0.000000e+00 : f32
      %c0_98 = arith.constant 0 : index
      %220 = memref.load %arg16[%c0_98] : memref<4xf32, #tpu.memory_space<smem>>
      memref.store %cst_97, %arg16[%c0_98] : memref<4xf32, #tpu.memory_space<smem>>
      %c1_99 = arith.constant 1 : index
      %221 = memref.load %arg16[%c1_99] : memref<4xf32, #tpu.memory_space<smem>>
      memref.store %139, %arg16[%c1_99] : memref<4xf32, #tpu.memory_space<smem>>
      %c2_100 = arith.constant 2 : index
      %222 = memref.load %arg16[%c2_100] : memref<4xf32, #tpu.memory_space<smem>>
      memref.store %219, %arg16[%c2_100] : memref<4xf32, #tpu.memory_space<smem>>
    } else {
    }
    %c0 = arith.constant 0 : index
    %c0_1 = arith.constant 0 : index
    %3 = vector.load %arg13[%c0, %c0_1] : memref<16x128xbf16, #tpu.memory_space<vmem>>, vector<16x128xbf16>
    %c0_2 = arith.constant 0 : index
    %c0_3 = arith.constant 0 : index
    %4 = vector.load %arg12[%c0_2, %c0_3] : memref<16x128xf32, #tpu.memory_space<vmem>>, vector<16x128xf32>
    %c0_4 = arith.constant 0 : index
    %c0_5 = arith.constant 0 : index
    %c0_6 = arith.constant 0 : index
    %5 = vector.load %arg9[%c0_4, %c0_5, %c0_6] : memref<4x16x16xbf16, #tpu.memory_space<vmem>>, vector<1x16x16xbf16>
    %6 = vector.shape_cast %5 : vector<1x16x16xbf16> to vector<16x16xbf16>
    %cst = arith.constant dense<0.000000e+00> : vector<16x128xf32>
    %7 = tpu.matmul %6, %3, %cst {dimension_numbers = #tpu.dot_dimension_numbers<[1], [0], [0], [1], [0, 0, 1, 1], [], []>} : vector<16x16xbf16>, vector<16x128xbf16>, vector<16x128xf32> -> vector<16x128xf32>
    %8 = arith.mulf %7, %4 : vector<16x128xf32>
    %cst_7 = arith.constant dense<0.000000e+00> : vector<128xf32>
    %9 = vector.multi_reduction <add>, %8, %cst_7 [0] : vector<16x128xf32> to vector<128xf32>
    %10 = vector.shape_cast %9 : vector<128xf32> to vector<1x128xf32>
    %c0_8 = arith.constant 0 : index
    %c0_9 = arith.constant 0 : index
    %11 = vector.load %arg15[%c0_8, %c0_9] : memref<4x128xf32, #tpu.memory_space<vmem>>, vector<1x128xf32>
    tpu.vector_store %arg15[%c0_8, %c0_9], %10 {strides = array<i32>} : memref<4x128xf32, #tpu.memory_space<vmem>>, vector<1x128xf32>,
    %c1 = arith.constant 1 : index
    %c0_10 = arith.constant 0 : index
    %c0_11 = arith.constant 0 : index
    %12 = vector.load %arg9[%c1, %c0_10, %c0_11] : memref<4x16x16xbf16, #tpu.memory_space<vmem>>, vector<1x16x16xbf16>
    %13 = vector.shape_cast %12 : vector<1x16x16xbf16> to vector<16x16xbf16>
    %cst_12 = arith.constant dense<0.000000e+00> : vector<16x128xf32>
    %14 = tpu.matmul %13, %3, %cst_12 {dimension_numbers = #tpu.dot_dimension_numbers<[1], [0], [0], [1], [0, 0, 1, 1], [], []>} : vector<16x16xbf16>, vector<16x128xbf16>, vector<16x128xf32> -> vector<16x128xf32>
    %15 = arith.mulf %14, %4 : vector<16x128xf32>
    %cst_13 = arith.constant dense<0.000000e+00> : vector<128xf32>
    %16 = vector.multi_reduction <add>, %15, %cst_13 [0] : vector<16x128xf32> to vector<128xf32>
    %17 = vector.shape_cast %16 : vector<128xf32> to vector<1x128xf32>
    %c1_14 = arith.constant 1 : index
    %c0_15 = arith.constant 0 : index
    %18 = vector.load %arg15[%c1_14, %c0_15] : memref<4x128xf32, #tpu.memory_space<vmem>>, vector<1x128xf32>
    tpu.vector_store %arg15[%c1_14, %c0_15], %17 {strides = array<i32>} : memref<4x128xf32, #tpu.memory_space<vmem>>, vector<1x128xf32>,
    %c2 = arith.constant 2 : index
    %c0_16 = arith.constant 0 : index
    %c0_17 = arith.constant 0 : index
    %19 = vector.load %arg9[%c2, %c0_16, %c0_17] : memref<4x16x16xbf16, #tpu.memory_space<vmem>>, vector<1x16x16xbf16>
    %20 = vector.shape_cast %19 : vector<1x16x16xbf16> to vector<16x16xbf16>
    %cst_18 = arith.constant dense<0.000000e+00> : vector<16x128xf32>
    %21 = tpu.matmul %20, %3, %cst_18 {dimension_numbers = #tpu.dot_dimension_numbers<[1], [0], [0], [1], [0, 0, 1, 1], [], []>} : vector<16x16xbf16>, vector<16x128xbf16>, vector<16x128xf32> -> vector<16x128xf32>
    %22 = arith.mulf %21, %4 : vector<16x128xf32>
    %cst_19 = arith.constant dense<0.000000e+00> : vector<128xf32>
    %23 = vector.multi_reduction <add>, %22, %cst_19 [0] : vector<16x128xf32> to vector<128xf32>
    %24 = vector.shape_cast %23 : vector<128xf32> to vector<1x128xf32>
    %c2_20 = arith.constant 2 : index
    %c0_21 = arith.constant 0 : index
    %25 = vector.load %arg15[%c2_20, %c0_21] : memref<4x128xf32, #tpu.memory_space<vmem>>, vector<1x128xf32>
    tpu.vector_store %arg15[%c2_20, %c0_21], %24 {strides = array<i32>} : memref<4x128xf32, #tpu.memory_space<vmem>>, vector<1x128xf32>,
    %c3 = arith.constant 3 : index
    %c0_22 = arith.constant 0 : index
    %c0_23 = arith.constant 0 : index
    %26 = vector.load %arg9[%c3, %c0_22, %c0_23] : memref<4x16x16xbf16, #tpu.memory_space<vmem>>, vector<1x16x16xbf16>
    %27 = vector.shape_cast %26 : vector<1x16x16xbf16> to vector<16x16xbf16>
    %cst_24 = arith.constant dense<0.000000e+00> : vector<16x128xf32>
    %28 = tpu.matmul %27, %3, %cst_24 {dimension_numbers = #tpu.dot_dimension_numbers<[1], [0], [0], [1], [0, 0, 1, 1], [], []>} : vector<16x16xbf16>, vector<16x128xbf16>, vector<16x128xf32> -> vector<16x128xf32>
    %29 = arith.mulf %28, %4 : vector<16x128xf32>
    %cst_25 = arith.constant dense<0.000000e+00> : vector<128xf32>
    %30 = vector.multi_reduction <add>, %29, %cst_25 [0] : vector<16x128xf32> to vector<128xf32>
    %31 = vector.shape_cast %30 : vector<128xf32> to vector<1x128xf32>
    %c3_26 = arith.constant 3 : index
    %c0_27 = arith.constant 0 : index
    %32 = vector.load %arg15[%c3_26, %c0_27] : memref<4x128xf32, #tpu.memory_space<vmem>>, vector<1x128xf32>
    tpu.vector_store %arg15[%c3_26, %c0_27], %31 {strides = array<i32>} : memref<4x128xf32, #tpu.memory_space<vmem>>, vector<1x128xf32>,
    %33 = tpu.iota {dimensions = array<i32: 0>} : vector<4x128xi32>
    %c4_i32 = arith.constant 4 : i32
    %34 = arith.muli %arg0, %c4_i32 : i32
    %35 = vector.broadcast %34 : i32 to vector<4x128xi32>
    %36 = arith.addi %33, %35 : vector<4x128xi32>
    %c0_28 = arith.constant 0 : index
    %c0_29 = arith.constant 0 : index
    %37 = vector.load %arg15[%c0_28, %c0_29] : memref<4x128xf32, #tpu.memory_space<vmem>>, vector<4x128xf32>
    %cst_30 = arith.constant 9.99999993E-9 : f32
    %38 = vector.broadcast %cst_30 : f32 to vector<4x128xf32>
    %39 = arith.addf %37, %38 : vector<4x128xf32>
    %40 = math.log %39 : vector<4x128xf32>
    %cst_31 = arith.constant 0.000000e+00 : f32
    %41 = vector.broadcast %cst_31 : f32 to vector<4x128xf32>
    %42 = arith.subf %41, %40 : vector<4x128xf32>
    %c12_i32 = arith.constant 12 : i32
    %43 = vector.broadcast %c12_i32 : i32 to vector<4x128xi32>
    %44 = arith.cmpi slt, %36, %43 : vector<4x128xi32>
    %c0_32 = arith.constant 0 : index
    %c0_33 = arith.constant 0 : index
    %45 = vector.load %arg14[%c0_32, %c0_33] : memref<1x128xf32, #tpu.memory_space<vmem>>, vector<1x128xf32>
    %46 = vector.broadcast %45 : vector<1x128xf32> to vector<4x128xf32>
    %47 = arith.mulf %46, %42 : vector<4x128xf32>
    %cst_34 = arith.constant 0.000000e+00 : f32
    %48 = vector.broadcast %cst_34 : f32 to vector<4x128xf32>
    %49 = arith.select %44, %47, %48 : vector<4x128xi1>, vector<4x128xf32>
    %50 = vector.shape_cast %49 : vector<4x128xf32> to vector<1x4x128xf32>
    %cst_35 = arith.constant dense<0.000000e+00> : vector<1xf32>
    %51 = vector.multi_reduction <add>, %50, %cst_35 [1, 2] : vector<1x4x128xf32> to vector<1xf32>
    %52 = vector.shape_cast %51 : vector<1xf32> to vector<1x1x1xf32>
    %53 = vector.extract %52[0, 0, 0] : f32 from vector<1x1x1xf32>
    %c0_36 = arith.constant 0 : index
    %54 = memref.load %arg16[%c0_36] : memref<4xf32, #tpu.memory_space<smem>>
    %55 = arith.addf %54, %53 : f32
    %c0_37 = arith.constant 0 : index
    %56 = memref.load %arg16[%c0_37] : memref<4xf32, #tpu.memory_space<smem>>
    memref.store %55, %arg16[%c0_37] : memref<4xf32, #tpu.memory_space<smem>>
    %c2_i32 = arith.constant 2 : i32
    %57 = arith.cmpi eq, %arg0, %c2_i32 : i32
    %58 = arith.extui %57 : i1 to i32
    %c0_i32_38 = arith.constant 0 : i32
    %59 = arith.cmpi ne, %58, %c0_i32_38 : i32
    scf.if %59 {
      %c0_39 = arith.constant 0 : index
      %60 = memref.load %arg16[%c0_39] : memref<4xf32, #tpu.memory_space<smem>>
      %c1_40 = arith.constant 1 : index
      %61 = memref.load %arg16[%c1_40] : memref<4xf32, #tpu.memory_space<smem>>
      %62 = arith.mulf %60, %61 : f32
      %cst_41 = arith.constant 0.0833333358 : f32
      %63 = arith.mulf %62, %cst_41 : f32
      %c0_42 = arith.constant 0 : index
      %c0_43 = arith.constant 0 : index
      %64 = memref.load %arg10[%c0_42, %c0_43] : memref<1x1xf32, #tpu.memory_space<smem>>
      memref.store %63, %arg10[%c0_42, %c0_43] : memref<1x1xf32, #tpu.memory_space<smem>>
      %c2_44 = arith.constant 2 : index
      %65 = memref.load %arg16[%c2_44] : memref<4xf32, #tpu.memory_space<smem>>
      %c0_45 = arith.constant 0 : index
      %c0_46 = arith.constant 0 : index
      %66 = memref.load %arg11[%c0_45, %c0_46] : memref<1x1xf32, #tpu.memory_space<smem>>
      memref.store %65, %arg11[%c0_45, %c0_46] : memref<1x1xf32, #tpu.memory_space<smem>>
    } else {
    }
    return
  }
  func.func @transform_0(%arg0: i32) -> (i32, i32) {
    %c0_i32 = arith.constant 0 : i32
    %c0_i32_0 = arith.constant 0 : i32
    %c0_i32_1 = arith.constant 0 : i32
    return %c0_i32, %c0_i32_0 : i32, i32
  }
  func.func @transform_1(%arg0: i32) -> (i32, i32) {
    %c0_i32 = arith.constant 0 : i32
    %c0_i32_0 = arith.constant 0 : i32
    %c0_i32_1 = arith.constant 0 : i32
    return %c0_i32, %c0_i32_0 : i32, i32
  }
  func.func @transform_2(%arg0: i32) -> (i32, i32) {
    %c0_i32 = arith.constant 0 : i32
    %c0_i32_0 = arith.constant 0 : i32
    %c0_i32_1 = arith.constant 0 : i32
    return %c0_i32, %c0_i32_0 : i32, i32
  }
  func.func @transform_3(%arg0: i32) -> (i32, i32) {
    %c0_i32 = arith.constant 0 : i32
    %c0_i32_0 = arith.constant 0 : i32
    %c0_i32_1 = arith.constant 0 : i32
    return %c0_i32, %c0_i32_0 : i32, i32
  }
  func.func @transform_4(%arg0: i32) -> (i32, i32) {
    %c0_i32 = arith.constant 0 : i32
    %c0_i32_0 = arith.constant 0 : i32
    %c0_i32_1 = arith.constant 0 : i32
    return %c0_i32, %c0_i32_0 : i32, i32
  }
  func.func @transform_5(%arg0: i32) -> (i32, i32) {
    %c0_i32 = arith.constant 0 : i32
    %c0_i32_0 = arith.constant 0 : i32
    %c0_i32_1 = arith.constant 0 : i32
    return %c0_i32, %c0_i32_0 : i32, i32
  }
  func.func @transform_6(%arg0: i32) -> (i32, i32) {
    %c0_i32 = arith.constant 0 : i32
    %c0_i32_0 = arith.constant 0 : i32
    %c0_i32_1 = arith.constant 0 : i32
    return %c0_i32, %c0_i32_0 : i32, i32
  }
  func.func @transform_7(%arg0: i32) -> (i32, i32) {
    %c0_i32 = arith.constant 0 : i32
    %c0_i32_0 = arith.constant 0 : i32
    %c0_i32_1 = arith.constant 0 : i32
    return %c0_i32, %c0_i32_0 : i32, i32
  }
  func.func @transform_8(%arg0: i32) -> (i32, i32, i32) {
    %c0_i32 = arith.constant 0 : i32
    %c0_i32_0 = arith.constant 0 : i32
    %c0_i32_1 = arith.constant 0 : i32
    return %arg0, %c0_i32, %c0_i32_0 : i32, i32, i32
  }
  func.func @transform_9(%arg0: i32) -> (i32, i32) {
    %c0_i32 = arith.constant 0 : i32
    %c0_i32_0 = arith.constant 0 : i32
    %c0_i32_1 = arith.constant 0 : i32
    return %c0_i32, %c0_i32_0 : i32, i32
  }
  func.func @transform_10(%arg0: i32) -> (i32, i32) {
    %c0_i32 = arith.constant 0 : i32
    %c0_i32_0 = arith.constant 0 : i32
    %c0_i32_1 = arith.constant 0 : i32
    return %c0_i32, %c0_i32_0 : i32, i32
  }
}

</mosaic_0001>

<bundles_post_ra>
// kernel: tpu_custom_call.1
= control target key start
LH: loop header
LB: loop body
LE: loop exit
PB: predicated region body
PF: predicated region fallthrough
CT: control target
= control target key end

     0   :  { %16 = vsyncpa [#allocation8], 0  ;;  %s2649_s0 = inlined_call_operand.vmem [shape: s32[1,128], index: 0, kind: input, shape index: {}]   ;;  %s2650_s1 = inlined_call_operand.vmem [shape: s32[1,128], index: 1, kind: input, shape index: {}]   ;;  %s2651_s2 = inlined_call_operand.vmem [shape: s32[128,1], index: 2, kind: input, shape index: {}]   ;;  %s2652_s3 = inlined_call_operand.vmem [shape: s32[128,1], index: 3, kind: input, shape index: {}]   ;;  %s2653_s4 = inlined_call_operand.vmem [shape: f32[1,128], index: 4, kind: input, shape index: {}]   ;;  %s2654_s5 = inlined_call_operand.vmem [shape: f32[16,16], index: 5, kind: input, shape index: {}]   ;;  %s2655_s6 = inlined_call_operand.vmem [shape: f32[16,1], index: 6, kind: input, shape index: {}]   ;;  %s2656_s7 = inlined_call_operand.vmem [shape: f32[1,16], index: 7, kind: input, shape index: {}]   ;;  %s2657_s8 = inlined_call_operand.vmem [shape: bf16[12,16,16], index: 8, kind: input, shape index: {}]   ;;  %s2658_s9 = inlined_call_operand.hbm [shape: f32[1,1], index: 9, kind: output, shape index: {0}]   ;;  %s2659_s10 = inlined_call_operand.hbm [shape: f32[1,1], index: 10, kind: output, shape index: {1}]  }
   0x1   :  { %17 = vsyncpa [#allocation10], 0  ;;  %s1966_s13 = smov 0  }
   0x2 LB: > { %s1972_s14 = sadd.s32 4294967295, %s1901_s13   ;;  %p1582_p0 = scmp.ge.s32.totalorder %s1901_s13, 1  ;;  %s1901_s13 = sphi %s1966_s13, %s23_s13  }
   0x3   : > { %p309_p1 = scmp.lt.s32.totalorder %s1901_s13, 4 }
   0x5   : > { %p310_p2 = pnand %p1582_p0, %p309_p1 }
   0x6   : > { %s1977_s15 = sshll.u32 (!%p310_p2), %s1972_s14, 2  ;;  %p1586_p4 = scmp.ne.s32.totalorder (!%p310_p2), %s1972_s14, 0 }
   0x7   : > { %313 = sbr.rel (%p310_p2) target bundleno = 2009 (0x7d9), region = 56  ;;  %p344_p3 = scmp.lt.s32.totalorder (!%p310_p2), %s1977_s15, 11 }
   0xc   : > { %s345_s16 = scalar_select %p344_p3, %s1977_s15, 11 }
   0xd   : > { %354 = sbr.rel (%p1586_p4) target bundleno = 1538 (0x602), region = 60  ;;  %s1906_s28 = smov (!%p1586_p4), 0.0  }
   0xe   : > { %s1683_s17 = sshll.u32 %s345_s16, 3  ;;  %1203 = sst [smem:[#allocation6]] (!%p1586_p4), %s1906_s28 }
   0xf   : > { %s1984_s20 = scalar_lea.vmem %s2657_s8, %s1683_s17 }
  0x12   : > { %v359_v0 = vld [vmem:[%s2651_s2 + $0x10] sm:$0xff]  ;;  %v357_v1 = vld [vmem:[%s2651_s2] sm:$0xff]  ;;  %v1903_v2 = vmov 0   ;;  %v360_v3 = vld [vmem:[%s2651_s2 + $0x18] sm:$0xff]  ;;  %v542_v33 = vlaneseq  ;;  %v1904_v37 = vmov 0.0  }
  0x13   : > { %1845 = vset.pattern.permute.xlu1 %v1903_v2  ;;  %1844 = vset.pattern.permute.xlu0 %v1903_v2  ;;  %v358_v4 = vld [vmem:[%s2651_s2 + $0x8] sm:$0xff]  ;;  %v361_v6 = vld [vmem:[%s2651_s2 + $0x20] sm:$0xff]  ;;  %v364_v7 = vld [vmem:[%s2651_s2 + $0x38] sm:$0xff] }
  0x14   : > { %397 = vperm.xlu1 %1845, %v359_v0   ;;  %391 = vperm.xlu0 %1844, %v357_v1   ;;  %v362_v5 = vld [vmem:[%s2651_s2 + $0x28] sm:$0xff]  ;;  %v363_v8 = vld [vmem:[%s2651_s2 + $0x30] sm:$0xff]  ;;  %v373_v10 = vld [vmem:[%s2652_s3] sm:$0xff]  ;;  %v2083_v34 = vshrl.u32 %v542_v33, 7  ;;  %v2128_v59 = vand.u32 127, %v542_v33 }
  0x15   : > { %v374_v9 = vld [vmem:[%s2652_s3 + $0x8] sm:$0xff]  ;;  %v376_v11 = vld [vmem:[%s2652_s3 + $0x18] sm:$0xff]  ;;  %v375_v12 = vld [vmem:[%s2652_s3 + $0x10] sm:$0xff] }
  0x16   : > { %v378_v13 = vld [vmem:[%s2652_s3 + $0x28] sm:$0xff]  ;;  %v377_v14 = vld [vmem:[%s2652_s3 + $0x20] sm:$0xff]  ;;  %v380_v15 = vld [vmem:[%s2652_s3 + $0x38] sm:$0xff]  ;;  %v2086_v35 = vadd.s32 8, %v2083_v34  ;;  %v546_v62 = vadd.s32 24, %v2083_v34  ;;  %v545_v0 = vadd.s32 16, %v2083_v34 }
  0x17   : > { %v379_v16 = vld [vmem:[%s2652_s3 + $0x30] sm:$0xff]  ;;  %v366_v17 = vld [vmem:[%s2651_s2 + $0x48] sm:$0xff]  ;;  %v365_v18 = vld [vmem:[%s2651_s2 + $0x40] sm:$0xff]  ;;  %v558_v33 = vadd.s32 120, %v2083_v34 }
  0x18   : > { %400 = vperm.xlu1 %1845, %v360_v3   ;;  %394 = vperm.xlu0 %1844, %v358_v4   ;;  %v368_v19 = vld [vmem:[%s2651_s2 + $0x58] sm:$0xff]  ;;  %v367_v20 = vld [vmem:[%s2651_s2 + $0x50] sm:$0xff]  ;;  %v382_v21 = vld [vmem:[%s2652_s3 + $0x48] sm:$0xff]  ;;  %v548_v4 = vadd.s32 40, %v2083_v34  ;;  %vm2672_vm14 = vcmp.gt.s32.totalorder %v2086_v35, %v2128_v59 }
  0x19   : > { %v381_v22 = vld [vmem:[%s2652_s3 + $0x40] sm:$0xff]  ;;  %v384_v23 = vld [vmem:[%s2652_s3 + $0x58] sm:$0xff]  ;;  %v383_v24 = vld [vmem:[%s2652_s3 + $0x50] sm:$0xff] }
  0x1a   : > { %v369_v25 = vld [vmem:[%s2651_s2 + $0x60] sm:$0xff]  ;;  %v388_v26 = vld [vmem:[%s2652_s3 + $0x78] sm:$0xff]  ;;  %v371_v27 = vld [vmem:[%s2651_s2 + $0x70] sm:$0xff] }
  0x1b   : > { %v370_v28 = vld [vmem:[%s2651_s2 + $0x68] sm:$0xff]  ;;  %v385_v29 = vld [vmem:[%s2652_s3 + $0x60] sm:$0xff]  ;;  %v372_v30 = vld [vmem:[%s2651_s2 + $0x78] sm:$0xff] }
  0x1c   : > { %406 = vperm.xlu1 %1845, %v362_v5   ;;  %403 = vperm.xlu0 %1844, %v361_v6   ;;  %v387_v31 = vld [vmem:[%s2652_s3 + $0x70] sm:$0xff]  ;;  %v386_v32 = vld [vmem:[%s2652_s3 + $0x68] sm:$0xff]  ;;  %v2091_v36 = vld [vmem:[%s2649_s0] ss:$0 sm:$0xff]  ;;  %v547_v5 = vadd.s32 32, %v2083_v34 }
  0x1d   : > { %vm649_vm0 = vcmp.eq.s32.totalorder %v2083_v34, %v2091_v36  ;;  %vm650_vm1 = vcmp.eq.s32.totalorder %v2086_v35, %v2091_v36  ;;  %v2126_v58 = vld [vmem:[%s2650_s1] ss:$0 sm:$0xff] }
  0x1e   : > { %v2098_v38 = vsel %vm649_vm0, 1.0, %v1904_v37  ;;  %v2101_v39 = vsel %vm650_vm1, 1.0, %v1904_v37 }
  0x1f   : > { %661 = vst [vmem:[#allocation2] sm:$0xff] %v2098_v38  ;;  %662 = vst [vmem:[#allocation2 + $0x8] sm:$0xff] %v2101_v39 }
  0x20   : > { %412 = vperm.xlu1 %1845, %v364_v7   ;;  %409 = vperm.xlu0 %1844, %v363_v8   ;;  %v550_v7 = vadd.s32 56, %v2083_v34 }
  0x24   : > { %462 = vperm.xlu1 %1845, %v374_v9   ;;  %459 = vperm.xlu0 %1844, %v373_v10   ;;  %v549_v9 = vadd.s32 48, %v2083_v34 }
  0x28   : > { %468 = vperm.xlu1 %1845, %v376_v11   ;;  %465 = vperm.xlu0 %1844, %v375_v12   ;;  %v552_v11 = vadd.s32 72, %v2083_v34 }
  0x2c   : > { %474 = vperm.xlu1 %1845, %v378_v13   ;;  %471 = vperm.xlu0 %1844, %v377_v14  }
  0x30   : > { %480 = vperm.xlu1 %1845, %v380_v15   ;;  %477 = vperm.xlu0 %1844, %v379_v16   ;;  %v2676_v16 = vmov 0 }
  0x34   : > { %418 = vperm.xlu1 %1845, %v366_v17   ;;  %415 = vperm.xlu0 %1844, %v365_v18   ;;  %v2679_v17 = vmov 0  ;;  %v2682_v18 = vmov 0 }
  0x38   : > { %424 = vperm.xlu1 %1845, %v368_v19   ;;  %421 = vperm.xlu0 %1844, %v367_v20   ;;  %v551_v19 = vadd.s32 64, %v2083_v34  ;;  %v2686_v20 = vmov 0 }
  0x3c   : > { %486 = vperm.xlu1 %1845, %v382_v21   ;;  %483 = vperm.xlu0 %1844, %v381_v22   ;;  %v2689_v21 = vmov 0 }
  0x40   : > { %492 = vperm.xlu1 %1845, %v384_v23   ;;  %489 = vperm.xlu0 %1844, %v383_v24  }
  0x44   : > { %427 = vperm.xlu1 %1845, %v369_v25   ;;  %504 = vperm.xlu0 %1844, %v388_v26   ;;  %v554_v25 = vadd.s32 88, %v2083_v34 }
  0x48   : > { %433 = vperm.xlu1 %1845, %v371_v27   ;;  %430 = vperm.xlu0 %1844, %v370_v28   ;;  %v553_v27 = vadd.s32 80, %v2083_v34  ;;  %v1905_v28 = vmov 1.0  }
  0x4c   : > { %495 = vperm.xlu1 %1845, %v385_v29   ;;  %436 = vperm.xlu0 %1844, %v372_v30   ;;  %v2697_v29 = vmov 0  ;;  %v555_v30 = vadd.s32 96, %v2083_v34 }
  0x50   : > { %501 = vperm.xlu1 %1845, %v387_v31   ;;  %498 = vperm.xlu0 %1844, %v386_v32  }
  0x8f   : > { %v398_v40 = vpop.permute.xlu1 %397  ;;  %v392_v41 = vpop.permute.xlu0 %391 }
  0x90   : > { %vm442_vm6 = vcmp.eq.s32.totalorder %v392_v41, %v2091_v36  ;;  %vm444_vm13 = vcmp.eq.s32.totalorder %v398_v40, %v2091_v36  ;;  %v557_v40 = vadd.s32 112, %v2083_v34  ;;  %v2317_v41 = vadd.s32 104, %v2083_v34 }
  0x93   : > { %v401_v42 = vpop.permute.xlu1 %400  ;;  %v395_v43 = vpop.permute.xlu0 %394 }
  0x94   : > { %vm443_vm4 = vcmp.eq.s32.totalorder %v395_v43, %v2091_v36  ;;  %vm445_vm10 = vcmp.eq.s32.totalorder %v401_v42, %v2091_v36 }
  0x97   : > { %v407_v44 = vpop.permute.xlu1 %406  ;;  %v404_v45 = vpop.permute.xlu0 %403 }
  0x98   : > { %vm447_vm1 = vcmp.eq.s32.totalorder %v407_v44, %v2091_v36 }
  0x9b   : > { %v413_v46 = vpop.permute.xlu1 %412  ;;  %v410_v47 = vpop.permute.xlu0 %409 }
  0x9f   : > { %v2105_v48 = vpop.permute.xlu1 %462  ;;  %v2107_v49 = vpop.permute.xlu0 %459 }
  0xa0   : > { %vm511_vm2 = vcmp.eq.s32.totalorder %v2105_v48, %v2126_v58  ;;  %vm510_vm3 = vcmp.eq.s32.totalorder %v2107_v49, %v2126_v58 }
  0xa1   : > { %vm2145_vm8 = vmand %vm443_vm4, %vm511_vm2  ;;  %vm448_vm2 = vcmp.eq.s32.totalorder %v410_v47, %v2091_v36 }
  0xa2   : > { %vm2157_vm11 = vmand %vm442_vm6, %vm510_vm3 }
  0xa3   : > { %v2109_v50 = vpop.permute.xlu1 %468  ;;  %v2111_v51 = vpop.permute.xlu0 %465 }
  0xa4   : > { %vm513_vm5 = vcmp.eq.s32.totalorder %v2109_v50, %v2126_v58  ;;  %vm512_vm9 = vcmp.eq.s32.totalorder %v2111_v51, %v2126_v58 }
  0xa5   : > { %vm2171_vm15 = vmand %vm445_vm10, %vm513_vm5  ;;  %vm446_vm5 = vcmp.eq.s32.totalorder %v404_v45, %v2091_v36 }
  0xa6   : > { %vm2183_vm3 = vmand %vm444_vm13, %vm512_vm9  ;;  %vm449_vm9 = vcmp.eq.s32.totalorder %v413_v46, %v2091_v36 }
  0xa7   : > { %v2113_v52 = vpop.permute.xlu1 %474  ;;  %v2115_v53 = vpop.permute.xlu0 %471 }
  0xa8   : > { %vm515_vm12 = vcmp.eq.s32.totalorder %v2113_v52, %v2126_v58  ;;  %vm514_vm0 = vcmp.eq.s32.totalorder %v2115_v53, %v2126_v58 }
  0xa9   : > { %vm2192_vm10 = vmand %vm447_vm1, %vm515_vm12 }
  0xaa   : > { %vm530_vm12 = vmand %vm446_vm5, %vm514_vm0  ;;  %vm2675_vm5 = vcmp.gt.s32.totalorder %v2083_v34, %v2128_v59 }
  0xab   : > { %v2117_v54 = vpop.permute.xlu1 %480  ;;  %v2119_v55 = vpop.permute.xlu0 %477  ;;  %vm2225_vm0 = vmand %vm2145_vm8, %vm2672_vm14  ;;  %vm2681_vm8 = vcmp.gt.s32.totalorder %v545_v0, %v2128_v59 }
  0xac   : > { %vm517_vm4 = vcmp.eq.s32.totalorder %v2117_v54, %v2126_v58  ;;  %vm2234_vm6 = vmand %vm2157_vm11, %vm2675_vm5  ;;  %vm567_vm11 = vcmp.gt.s32.totalorder %v549_v9, %v2128_v59  ;;  %vm2684_vm5 = vcmp.eq.s32.totalorder %v2119_v55, %v2126_v58 }
  0xad   : > { %vm2216_vm7 = vmand %vm449_vm9, %vm517_vm4  ;;  %v2677_v16 = vsel %vm2234_vm6, 4294967295, %v2676_v16  ;;  %vm2678_vm4 = vcmp.gt.s32.totalorder %v546_v62, %v2128_v59 }
  0xae   : > { %vm2242_vm9 = vmand %vm2171_vm15, %vm2678_vm4  ;;  %vm2685_vm15 = vcmp.gt.s32.totalorder %v548_v4, %v2128_v59 }
  0xaf   : > { %v419_v56 = vpop.permute.xlu1 %418  ;;  %v2121_v57 = vpop.permute.xlu0 %415  ;;  %v2680_v17 = vsel %vm2242_vm9, 4294967295, %v2679_v17  ;;  %vm2250_vm14 = vmand %vm2183_vm3, %vm2681_vm8  ;;  %vm2688_vm3 = vcmp.gt.s32.totalorder %v547_v5, %v2128_v59  ;;  %vm2692_vm9 = vcmp.gt.s32.totalorder %v550_v7, %v2128_v59 }
  0xb0   : > { %v2683_v18 = vsel %vm2250_vm14, 4294967295, %v2682_v18  ;;  %vm532_vm1 = vmand %vm448_vm2, %vm2684_vm5  ;;  %vm451_vm13 = vcmp.eq.s32.totalorder %v419_v56, %v2091_v36  ;;  %vm570_vm2 = vcmp.gt.s32.totalorder %v552_v11, %v2128_v59 }
  0xb1   : > { %vm2264_vm4 = vmand %vm2192_vm10, %vm2685_vm15 }
  0xb2   : > { %v2687_v20 = vsel %vm2264_vm4, 4294967295, %v2686_v20  ;;  %vm2270_vm8 = vmand %vm530_vm12, %vm2688_vm3  ;;  %vm573_vm4 = vcmp.gt.s32.totalorder %v555_v30, %v2128_v59 }
  0xb3   : > { %v2130_v60 = vpop.permute.xlu1 %424  ;;  %v2132_v61 = vpop.permute.xlu0 %421  ;;  %v2690_v21 = vsel %vm2270_vm8, 4294967295, %v2689_v21  ;;  %vm2282_vm10 = vmand %vm2216_vm7, %vm2692_vm9  ;;  %vm450_vm7 = vcmp.eq.s32.totalorder %v2121_v57, %v2091_v36  ;;  %v1590_v57 = vsel %vm2225_vm0, 1.0, %v1904_v37 }
  0xb4   : > { %vm2290_vm3 = vmand %vm532_vm1, %vm567_vm11  ;;  %v1596_v43 = vsel %vm2282_vm10, 1.0, %v1904_v37  ;;  %vm2711_vm0 = vnez %v2690_v21 }
  0xb5   : > { %v1595_v47 = vsel %vm2290_vm3, 1.0, %v1904_v37  ;;  %vm2708_vm3 = vnez %v2680_v17  ;;  %v1593_v0 = vsel %vm2711_vm0, 1.0, %v1904_v37 }
  0xb7   : > { %v2152_v1 = vpop.permute.xlu1 %486  ;;  %v2154_v2 = vpop.permute.xlu0 %483 }
  0xb8   : > { %vm2691_vm5 = vcmp.eq.s32.totalorder %v2152_v1, %v2126_v58  ;;  %vm518_vm12 = vcmp.eq.s32.totalorder %v2154_v2, %v2126_v58 }
  0xb9   : > { %vm535_vm14 = vmand %vm451_vm13, %vm2691_vm5  ;;  %vm453_vm5 = vcmp.eq.s32.totalorder %v2130_v60, %v2091_v36 }
  0xba   : > { %vm2300_vm9 = vmand %vm535_vm14, %vm570_vm2  ;;  %vm452_vm14 = vcmp.eq.s32.totalorder %v2132_v61, %v2091_v36  ;;  %vm572_vm2 = vcmp.gt.s32.totalorder %v554_v25, %v2128_v59  ;;  %v1592_v61 = vsel %vm2708_vm3, 1.0, %v1904_v37 }
  0xbb   : > { %v2199_v12 = vpop.permute.xlu1 %492  ;;  %v2201_v13 = vpop.permute.xlu0 %489  ;;  %v2698_v29 = vsel %vm2300_vm9, 4294967295, %v2697_v29  ;;  %vm534_vm13 = vmand %vm450_vm7, %vm518_vm12  ;;  %vm571_vm12 = vcmp.gt.s32.totalorder %v553_v27, %v2128_v59  ;;  %vm2700_vm9 = vcmp.gt.s32.totalorder %v551_v19, %v2128_v59  ;;  %v628_v3 = vmax.f32 %v1592_v61, %v1596_v43 }
  0xbc   : > { %vm520_vm11 = vcmp.eq.s32.totalorder %v2201_v13, %v2126_v58  ;;  %vm2328_vm8 = vmand %vm534_vm13, %vm2700_vm9 }
  0xbd   : > { %vm536_vm7 = vmand %vm452_vm14, %vm520_vm11  ;;  %vm575_vm11 = vcmp.gt.s32.totalorder %v557_v40, %v2128_v59  ;;  %v1597_v15 = vsel %vm2328_vm8, 1.0, %v1904_v37 }
  0xbe   : > { %vm2347_vm9 = vmand %vm536_vm7, %vm571_vm12  ;;  %vm2710_vm7 = vnez %v2687_v20 }
  0xbf   : > { %v428_v22 = vpop.permute.xlu1 %427  ;;  %v505_v23 = vpop.permute.xlu0 %504  ;;  %v1594_v63 = vsel %vm2710_vm7, 1.0, %v1904_v37  ;;  %v1599_v8 = vsel %vm2347_vm9, 1.0, %v1904_v37 }
  0xc0   : > { %vm688_vm15 = vcmp.eq.s32.totalorder %v2128_v59, %v505_v23  ;;  %vm454_vm10 = vcmp.eq.s32.totalorder %v428_v22, %v2091_v36  ;;  %v626_v11 = vmax.f32 %v1590_v57, %v1594_v63 }
  0xc1   : > { %1723 = vmatprep.subr.msk.mxu0 %vm688_vm15, %v1905_v28 }
  0xc2   : > { %1724 = vmatpush3.msk.msra.mxu0 %vm688_vm15, %v1905_v28  ;;  %vm2699_vm15 = vcmp.eq.s32.totalorder %v2199_v12, %v2126_v58 }
  0xc3   : > { %v434_v31 = vpop.permute.xlu1 %433  ;;  %v431_v32 = vpop.permute.xlu0 %430  ;;  %vm537_vm1 = vmand %vm453_vm5, %vm2699_vm15  ;;  %vm576_vm5 = vcmp.gt.s32.totalorder %v558_v33, %v2128_v59  ;;  %vm2709_vm15 = vnez %v2683_v18 }
  0xc4   : > { %vm2336_vm6 = vmand %vm537_vm1, %vm572_vm2  ;;  %vm2707_vm2 = vnez %v2677_v16  ;;  %v1591_v62 = vsel %vm2709_vm15, 1.0, %v1904_v37 }
  0xc5   : > { %v1589_v60 = vsel %vm2707_vm2, 1.0, %v1904_v37  ;;  %vm525_vm2 = vcmp.eq.s32.totalorder %v505_v23, %v2126_v58  ;;  %v627_v5 = vmax.f32 %v1591_v62, %v1595_v47  ;;  %v1600_v7 = vsel %vm2336_vm6, 1.0, %v1904_v37 }
  0xc6   : > { %v625_v14 = vmax.f32 %v1589_v60, %v1593_v0  ;;  %v632_v17 = vmax.f32 %v628_v3, %v1600_v7 }
  0xc7   : > { %v496_v45 = vpop.permute.xlu1 %495  ;;  %v437_v46 = vpop.permute.xlu0 %436  ;;  %v631_v18 = vmax.f32 %v627_v5, %v1599_v8 }
  0xc8   : > { %vm522_vm1 = vcmp.eq.s32.totalorder %v496_v45, %v2126_v58  ;;  %vm457_vm14 = vcmp.eq.s32.totalorder %v437_v46, %v2091_v36  ;;  %vm685_vm0 = vcmp.eq.s32.totalorder %v2128_v59, %v496_v45 }
  0xc9   : > { %vm538_vm12 = vmand %vm454_vm10, %vm522_vm1  ;;  %vm2714_vm10 = vnez %v2698_v29 }
  0xca   : > { %vm2375_vm13 = vmand %vm538_vm12, %vm573_vm4  ;;  %v1598_v6 = vsel %vm2714_vm10, 1.0, %v1904_v37  ;;  %vm456_vm4 = vcmp.eq.s32.totalorder %v434_v31, %v2091_v36  ;;  %vm683_vm10 = vcmp.eq.s32.totalorder %v2128_v59, %v2201_v13 }
  0xcb   : > { %vm541_vm1 = vmand %vm457_vm14, %vm525_vm2  ;;  %v502_v9 = vpop.permute.xlu1 %501  ;;  %v499_v10 = vpop.permute.xlu0 %498  ;;  %v630_v19 = vmax.f32 %v626_v11, %v1598_v6  ;;  %v1601_v20 = vsel %vm2375_vm13, 1.0, %v1904_v37  ;;  %vm684_vm13 = vcmp.eq.s32.totalorder %v2128_v59, %v2199_v12 }
  0xcc   : > { %vm592_vm3 = vmand %vm541_vm1, %vm576_vm5  ;;  %vm524_vm15 = vcmp.eq.s32.totalorder %v502_v9, %v2126_v58  ;;  %vm687_vm12 = vcmp.eq.s32.totalorder %v2128_v59, %v502_v9  ;;  %vm523_vm6 = vcmp.eq.s32.totalorder %v499_v10, %v2126_v58  ;;  %vm455_vm5 = vcmp.eq.s32.totalorder %v431_v32, %v2091_v36 }
  0xcd   : > { %v1604_v16 = vsel %vm592_vm3, 1.0, %v1904_v37  ;;  %vm540_vm9 = vmand %vm456_vm4, %vm524_vm15  ;;  %1725 = vmatprep.subr.msk.mxu0 %vm687_vm12, %v1905_v28  ;;  %vm686_vm7 = vcmp.eq.s32.totalorder %v2128_v59, %v499_v10  ;;  %v629_v36 = vmax.f32 %v625_v14, %v1597_v15  ;;  %vm682_vm1 = vcmp.eq.s32.totalorder %v2128_v59, %v2152_v1 }
  0xce   : > { %vm591_vm14 = vmand %vm540_vm9, %vm575_vm11  ;;  %1726 = vmatpush3.msk.msra.mxu0 %vm687_vm12, %v1905_v28  ;;  %v636_v22 = vmax.f32 %v632_v17, %v1604_v16  ;;  %vm2715_vm11 = vcmp.gt.s32.totalorder %v2317_v41, %v2128_v59  ;;  %vm681_vm4 = vcmp.eq.s32.totalorder %v2128_v59, %v2154_v2  ;;  %vm680_vm3 = vcmp.eq.s32.totalorder %v2128_v59, %v2117_v54 }
  0xcf   : > { %v1603_v21 = vsel %vm591_vm14, 1.0, %v1904_v37  ;;  %vm539_vm8 = vmand %vm455_vm5, %vm523_vm6  ;;  %1727 = vmatprep.subr.msk.mxu0 %vm686_vm7, %v1905_v28  ;;  %v633_v25 = vmax.f32 %v629_v36, %v1601_v20  ;;  %vm679_vm15 = vcmp.eq.s32.totalorder %v2128_v59, %v2119_v55  ;;  %vm678_vm12 = vcmp.eq.s32.totalorder %v2128_v59, %v2113_v52  ;;  %v389_v52 = vld [vmem:[%s2653_s4] sm:$0x1] }
  0xd0   : > { %v635_v23 = vmax.f32 %v631_v18, %v1603_v21  ;;  %vm590_vm2 = vmand %vm539_vm8, %vm2715_vm11  ;;  %1728 = vmatpush3.msk.msra.mxu0 %vm686_vm7, %v1905_v28  ;;  %vm677_vm6 = vcmp.eq.s32.totalorder %v2128_v59, %v2115_v53  ;;  %vm676_vm9 = vcmp.eq.s32.totalorder %v2128_v59, %v2109_v50  ;;  %vm675_vm5 = vcmp.eq.s32.totalorder %v2128_v59, %v2111_v51 }
  0xd1   : > { %v1602_v24 = vsel %vm590_vm2, 1.0, %v1904_v37  ;;  %1729 = vmatprep.subr.msk.mxu0 %vm685_vm0, %v1905_v28  ;;  %v725_v53 = vsub.s32 0, %v2083_v34  ;;  %vm674_vm7 = vcmp.eq.s32.totalorder %v2128_v59, %v2105_v48  ;;  %vm673_vm8 = vcmp.eq.s32.totalorder %v2128_v59, %v2107_v49 }
  0xd2   : > { %v638_v26 = vmax.f32 %v635_v23, %v636_v22  ;;  %v634_v27 = vmax.f32 %v630_v19, %v1602_v24  ;;  %1730 = vmatpush3.msk.msra.mxu0 %vm685_vm0, %v1905_v28  ;;  %vm807_vm0 = vcmask 130048  }
  0xd3   : > { %1731 = vmatprep.subr.msk.mxu0 %vm684_vm13, %v1905_v28 }
  0xd4   : > { %v637_v29 = vmax.f32 %v633_v25, %v634_v27  ;;  %1732 = vmatpush3.msk.msra.mxu0 %vm684_vm13, %v1905_v28 }
  0xd5   : > { %1733 = vmatprep.subr.msk.mxu0 %vm683_vm10, %v1905_v28 }
  0xd6   : > { %v639_v30 = vmax.f32 %v637_v29, %v638_v26  ;;  %1734 = vmatpush3.msk.msra.mxu0 %vm683_vm10, %v1905_v28 }
  0xd7   : > { %1735 = vmatprep.subr.msk.mxu0 %vm682_vm1, %v1905_v28 }
  0xd8   : > { %v640_v12 = vrot.slane %v639_v30, 4  ;;  %1736 = vmatpush3.msk.msra.mxu0 %vm682_vm1, %v1905_v28  ;;  %vm2495_vm1 = vcmp.eq.s32.totalorder %v2086_v35, %v2126_v58 }
  0xd9   : > { %1737 = vmatprep.subr.msk.mxu0 %vm681_vm4, %v1905_v28  ;;  %v1609_v10 = vsel %vm2495_vm1, 1.0, %v1904_v37  ;;  %1758 = vmatprep.subr.msk.mxu1 %vm2495_vm1, %v1905_v28 }
  0xda   : > { %1738 = vmatpush3.msk.msra.mxu0 %vm681_vm4, %v1905_v28  ;;  %v641_v13 = vmax.f32 %v639_v30, %v640_v12  ;;  %vm2507_vm4 = vcmp.eq.s32.totalorder %v2083_v34, %v2126_v58  ;;  %1759 = vmatpush3.msk.msra.mxu1 %vm2495_vm1, %v1905_v28 }
  0xdb   : > { %1739 = vmatprep.subr.msk.mxu0 %vm680_vm3, %v1905_v28  ;;  %v1608_v14 = vsel %vm2507_vm4, 1.0, %v1904_v37  ;;  %1760 = vmatprep.subr.msk.mxu1 %vm2507_vm4, %v1905_v28 }
  0xdc   : > { %1740 = vmatpush3.msk.msra.mxu0 %vm680_vm3, %v1905_v28  ;;  %v642_v1 = vrot.slane %v641_v13, 2  ;;  %v1687_v15 = vpack.c.bf16 %v1609_v10, %v1608_v14  ;;  %1761 = vmatpush3.msk.msra.mxu1 %vm2507_vm4, %v1905_v28 }
  0xdd   : > { %1741 = vmatprep.subr.msk.mxu0 %vm679_vm15, %v1905_v28  ;;  %1765 = vmatprep.subr.msk.mxu1 %vm2495_vm1, %v1905_v28 }
  0xde   : > { %1742 = vmatpush3.msk.msra.mxu0 %vm679_vm15, %v1905_v28  ;;  %v643_v2 = vmax.f32 %v641_v13, %v642_v1  ;;  %1688 = vst [vmem:[#allocation3] sm:$0xff] %v1687_v15  }
  0xdf   : > { %1743 = vmatprep.subr.msk.mxu0 %vm678_vm12, %v1905_v28 }
  0xe0   : > { %1744 = vmatpush3.msk.msra.mxu0 %vm678_vm12, %v1905_v28  ;;  %v644_v54 = vrot.slane %v643_v2, 1 }
  0xe1   : > { %1745 = vmatprep.subr.msk.mxu0 %vm677_vm6, %v1905_v28 }
  0xe2   : > { %1746 = vmatpush3.msk.msra.mxu0 %vm677_vm6, %v1905_v28  ;;  %v645_v55 = vmax.f32 %v643_v2, %v644_v54 }
  0xe3   : > { %1747 = vmatprep.subr.msk.mxu0 %vm676_vm9, %v1905_v28 }
  0xe4   : > { %1748 = vmatpush3.msk.msra.mxu0 %vm676_vm9, %v1905_v28  ;;  %vm646_vm14 = vcmp.eq.f32.partialorder %v645_v55, 0.0 }
  0xe5   : > { %1749 = vmatprep.subr.msk.mxu0 %vm675_vm5, %v1905_v28  ;;  %v2465_v50 = vsel %vm646_vm14, 1.0, %v1904_v37 }
  0xe6   : > { %1750 = vmatpush3.msk.msra.mxu0 %vm675_vm5, %v1905_v28  ;;  %v721_v31 = vmul.f32 %v2465_v50, %v389_v52 }
  0xe7   : > { %1751 = vmatprep.subr.msk.mxu0 %vm674_vm7, %v1905_v28 }
  0xe8   : > { %1752 = vmatpush3.msk.msra.mxu0 %vm674_vm7, %v1905_v28  ;;  %v726_v51 = vrot.slane %v721_v31, %v725_v53 }
  0xe9   : > { %1753 = vmatprep.subr.msk.mxu0 %vm673_vm8, %v1905_v28 }
  0xea   : > { %1754 = vmatpush3.msk.msra.mxu0 %vm673_vm8, %v1905_v28  ;;  %v728_v32 = vmul.f32 %v2098_v38, %v726_v51  ;;  %v729_v48 = vmul.f32 %v2101_v39, %v726_v51 }
  0xec   : > { %1755 = vmatprep.mubr.f32.mxu0 %v728_v32 }
  0xed   : > { %1756 = vmatmul.mubr.f32.vlgmr.msra.gmra.mxu0 %v729_v48 }
 0x1ad   : > { %v2479_v33 = vpop.f32.mrf.mxu0 }
 0x1ae   : > { %v811_v40 = vsel %vm807_vm0, %v2479_v33, -inf }
 0x1af   : > { %812 = vmax.xlane.f32.xlu1 %v811_v40  ;;  %v2483_v49 = vpop.f32.mrf.mxu0 }
 0x1b0   : > { %v808_v41 = vsel %vm807_vm0, %v2483_v49, -inf  ;;  %vm805_vm7 = vcmp.gt.f32.partialorder %v2483_v49, 0.1 }
 0x1b1   : > { %809 = vmax.xlane.f32.xlu0 %v808_v41  ;;  %v850_v42 = vmax.f32 %v808_v41, %v811_v40 }
 0x1b3   : > { %v851_v58 = vrot.slane %v850_v42, 4 }
 0x1b5   : > { %v852_v16 = vmax.f32 %v850_v42, %v851_v58 }
 0x1b7   : > { %v853_v17 = vrot.slane %v852_v16, 2 }
 0x1b9   : > { %v854_v18 = vmax.f32 %v852_v16, %v853_v17 }
 0x1bb   : > { %v855_v19 = vrot.slane %v854_v18, 1 }
 0x1bd   : > { %v856_v20 = vmax.f32 %v854_v18, %v855_v19 }
 0x1bf   : > { %vm857_vm3 = vcmp.eq.f32.partialorder %v2483_v49, %v856_v20  ;;  %vm858_vm15 = vcmp.eq.f32.partialorder %v2479_v33, %v856_v20 }
 0x1c0   : > { %v859_v21 = vsel %vm857_vm3, %v2083_v34, 16  ;;  %v860_v36 = vsel %vm858_vm15, %v2086_v35, 16 }
 0x1c1   : > { %v861_v22 = vsel %vm807_vm0, %v859_v21, 2147483647  ;;  %v862_v23 = vsel %vm807_vm0, %v860_v36, 2147483647 }
 0x1c2   : > { %vm863_vm12 = vcmp.lt.s32.totalorder %v861_v22, %v862_v23 }
 0x1c3   : > { %v864_v24 = vsel %vm863_vm12, %v861_v22, %v862_v23 }
 0x1c4   : > { %v865_v25 = vrot.slane %v864_v24, 4 }
 0x1c6   : > { %vm866_vm6 = vcmp.lt.s32.totalorder %v864_v24, %v865_v25 }
 0x1c7   : > { %v867_v26 = vsel %vm866_vm6, %v864_v24, %v865_v25 }
 0x1c8   : > { %v868_v27 = vrot.slane %v867_v26, 2 }
 0x1ca   : > { %vm869_vm9 = vcmp.lt.s32.totalorder %v867_v26, %v868_v27 }
 0x1cb   : > { %v870_v29 = vsel %vm869_vm9, %v867_v26, %v868_v27  ;;  %vm1124_vm9 = vcmask 7168  }
 0x1cc   : > { %v871_v30 = vrot.slane %v870_v29, 1 }
 0x1ce   : > { %vm872_vm5 = vcmp.lt.s32.totalorder %v870_v29, %v871_v30 }
 0x1cf   : > { %v873_v52 = vsel %vm872_vm5, %v870_v29, %v871_v30  ;;  %vm1142_vm5 = vcmask 122880  }
 0x1d0   : > { %vm874_vm8 = vcmp.eq.s32.totalorder %v2083_v34, %v873_v52  ;;  %vm875_vm15 = vcmp.eq.s32.totalorder %v2086_v35, %v873_v52 }
 0x238   : > { %v813_v43 = vpop.xlane.xlu1 %812 }
 0x239   : > { %vm815_vm11 = vcmp.eq.f32.partialorder %v2479_v33, %v813_v43  ;;  %v993_v43 = vld [vmem:[%s2654_s5] sm:$0xff] }
 0x23a   : > { %v817_v44 = vsel %vm815_vm11, %v2128_v59, 16  ;;  %v810_v45 = vpop.xlane.xlu0 %809 }
 0x23b   : > { %vm814_vm2 = vcmp.eq.f32.partialorder %v2483_v49, %v810_v45  ;;  %v833_v47 = vsel %vm807_vm0, %v817_v44, 2147483647 }
 0x23c   : > { %v816_v46 = vsel %vm814_vm2, %v2128_v59, 16  ;;  %v835_v61 = vshra.s32 %v833_v47, 16  ;;  %v834_v4 = vand.u32 65535, %v833_v47 }
 0x23d   : > { %v818_v56 = vsel %vm807_vm0, %v816_v46, 2147483647 }
 0x23e   : > { %v820_v57 = vshra.s32 %v818_v56, 16  ;;  %v837_v62 = vcvt.s32.f32 %v835_v61  ;;  %v819_v63 = vand.u32 65535, %v818_v56  ;;  %v836_v7 = vcvt.s32.f32 %v834_v4 }
 0x240   : > { %v822_v60 = vcvt.s32.f32 %v820_v57  ;;  %v821_v3 = vcvt.s32.f32 %v819_v63 }
 0x242   : > { %823 = vmin.xlane.f32.xlu0 %v822_v60 }
 0x246   : > { %838 = vmin.xlane.f32.xlu0 %v837_v62 }
 0x2cb   : > { %v824_v0 = vpop.xlane.xlu0 %823 }
 0x2cc   : > { %vm825_vm13 = vcmp.eq.f32.partialorder %v822_v60, %v824_v0  ;;  %v830_v12 = vcvt.f32.s32 %v824_v0 }
 0x2cd   : > { %v826_v5 = vsel %vm825_vm13, %v821_v3, inf  ;;  %vm806_vm13 = vcmp.gt.f32.partialorder %v2479_v33, 0.1 }
 0x2ce   : > { %827 = vmin.xlane.f32.xlu1 %v826_v5  ;;  %v831_v1 = vshll.u32 %v830_v12, 16 }
 0x2cf   : > { %v839_v6 = vpop.xlane.xlu0 %838 }
 0x2d0   : > { %vm840_vm10 = vcmp.eq.f32.partialorder %v837_v62, %v839_v6  ;;  %v845_v2 = vcvt.f32.s32 %v839_v6 }
 0x2d1   : > { %v841_v8 = vsel %vm840_vm10, %v836_v7, inf }
 0x2d2   : > { %842 = vmin.xlane.f32.xlu0 %v841_v8  ;;  %v846_v31 = vshll.u32 %v845_v2, 16 }
 0x357   : > { %v828_v13 = vpop.xlane.xlu1 %827 }
 0x358   : > { %v829_v54 = vcvt.f32.s32 %v828_v13 }
 0x35a   : > { %v832_v55 = vadd.s32 %v831_v1, %v829_v54 }
 0x35b   : > { %v843_v53 = vpop.xlane.xlu0 %842 }
 0x35c   : > { %vm848_vm14 = vcmp.eq.s32.totalorder %v2128_v59, %v832_v55  ;;  %v844_v51 = vcvt.f32.s32 %v843_v53 }
 0x35d   : > { %vm876_vm11 = vmand %vm805_vm7, %vm848_vm14 }
 0x35e   : > { %v847_v32 = vadd.s32 %v846_v31, %v844_v51  ;;  %vm878_vm2 = vmand %vm876_vm11, %vm874_vm8 }
 0x35f   : > { %v1644_v48 = vsel %vm878_vm2, 1.0, %v1904_v37 }
 0x360   : > { %vm849_vm10 = vcmp.eq.s32.totalorder %v2128_v59, %v847_v32  ;;  %v884_v40 = vmul.f32 %v1644_v48, %v2483_v49  ;;  %v994_v49 = vld [vmem:[%s2654_s5 + $0x8] sm:$0xff] }
 0x361   : > { %vm877_vm3 = vmand %vm806_vm13, %vm849_vm10 }
 0x362   : > { %vm879_vm12 = vmand %vm877_vm3, %vm875_vm15  ;;  %1762 = vmatprep.mubr.msk.f32.mxu1 %vm807_vm0, %v884_v40  ;;  %v886_v41 = vsel %vm807_vm0, %v884_v40, 0.0 }
 0x363   : > { %1102 = vadd.xlane.f32.xlu1 %v886_v41  ;;  %v1645_v34 = vsel %vm879_vm12, 1.0, %v1904_v37 }
 0x364   : > { %v885_v42 = vmul.f32 %v2479_v33, %v1645_v34 }
 0x366   : > { %1763 = vmatmul.mubr.msk.f32.vlgmr.msra.gmra.mxu1 %vm807_vm0, %v885_v42  ;;  %v887_v59 = vsel %vm807_vm0, %v885_v42, 0.0 }
 0x367   : > { %1766 = vmatpush3.msk.msra.mxu1 %vm2495_vm1, %v1905_v28  ;;  %1104 = vadd.xlane.f32.xlu0 %v887_v59  ;;  %v888_v35 = vadd.f32 %v887_v59, %v886_v41 }
 0x368   : > { %1767 = vmatprep.subr.msk.mxu1 %vm2507_vm4, %v1905_v28  ;;  %1769 = vmatprep.mubr.msk.f32.mxu1 %vm807_vm0, %v993_v43 }
 0x369   : > { %1768 = vmatpush3.msk.msra.mxu1 %vm2507_vm4, %v1905_v28  ;;  %889 = vadd.xlane.f32.xlu1 %v888_v35  ;;  %v1114_v23 = vrot.slane %v888_v35, 4  ;;  %vm1090_vm4 = vcmask 1040384  }
 0x36a   : > { %1770 = vmatmul.mubr.msk.f32.vlgmr.msra.gmra.mxu1 %vm807_vm0, %v994_v49 }
 0x36b   : > { %v1115_v29 = vadd.f32 %v1114_v23, %v888_v35 }
 0x3ec   : > { %v1103_v33 = vpop.xlane.xlu1 %1102 }
 0x3ed   : > { %vm1106_vm1 = vcmp.gt.f32.partialorder %v1103_v33, 0.0 }
 0x3ee   : > { %v2564_v44 = vsel %vm1106_vm1, 1.0, %v1904_v37 }
 0x3ef   : > { %v1112_v46 = vsub.f32 1.0, %v2564_v44 }
 0x3f0   : > { %v1105_v45 = vpop.xlane.xlu0 %1104 }
 0x3f1   : > { %vm1107_vm6 = vcmp.gt.f32.partialorder %v1105_v45, 0.0  ;;  %v1125_v61 = vsel %vm1124_vm9, %v1112_v46, 0.0 }
 0x3f2   : > { %v2568_v47 = vsel %vm1107_vm6, 1.0, %v1904_v37  ;;  %v890_v56 = vpop.xlane.xlu1 %889 }
 0x3f3   : > { %v1113_v57 = vsub.f32 1.0, %v2568_v47  ;;  %v891_v28 = vrot.slane %v890_v56, 4 }
 0x3f5   : > { %v892_v60 = vadd.f32 %v891_v28, %v890_v56  ;;  %v1126_v62 = vsel %vm1124_vm9, %v1113_v57, 0.0 }
 0x3f6   : > { %v1127_v63 = vadd.f32 %v1126_v62, %v1125_v61 }
 0x3f7   : > { %v893_v0 = vrot.slane %v892_v60, 2 }
 0x3f8   : > { %1128 = vadd.xlane.f32.xlu1 %v1127_v63 }
 0x3f9   : > { %v894_v3 = vadd.f32 %v893_v0, %v892_v60 }
 0x3fb   : > { %v895_v4 = vrot.slane %v894_v3, 1 }
 0x3fd   : > { %v896_v5 = vadd.f32 %v895_v4, %v894_v3 }
 0x3ff   : > { %1796 = vpush %v896_v5 }
 0x426   : > { %v1764_v6 = vpop.f32.mrf.mxu1 }
 0x427   : > { %v983_v8 = vmul.f32 %v1764_v6, %v2101_v39 }
 0x428   : > { %v973_v7 = vpop.f32.mrf.mxu1 }
 0x429   : > { %v982_v9 = vmul.f32 %v2098_v38, %v973_v7  ;;  %v1157_v7 = vld [vmem:[%s2655_s6] sm:$0xff] }
 0x42a   : > { %v1771_v10 = vpop.f32.mrf.mxu1 }
 0x42b   : > { %v984_v11 = vadd.f32 %v983_v8, %v982_v9  ;;  %v1077_v58 = vmul.f32 %v1771_v10, %v2101_v39  ;;  %v1158_v8 = vld [vmem:[%s2655_s6 + $0x8] sm:$0xff]  ;;  %v1160_v9 = vsub.f32 1.0, %v1157_v7 }
 0x42c   : > { %v1067_v14 = vpop.f32.mrf.mxu1  ;;  %v1161_v10 = vsub.f32 1.0, %v1158_v8 }
 0x42d   : > { %v985_v15 = vrot.slane %v984_v11, 4  ;;  %v1076_v16 = vmul.f32 %v2098_v38, %v1067_v14  ;;  %v1116_v38 = vrot.slane %v1115_v29, 2  ;;  %v1162_v14 = vadd.f32 1e-08, %v1160_v9 }
 0x42f   : > { %v986_v17 = vadd.f32 %v985_v15, %v984_v11  ;;  %v1078_v18 = vadd.f32 %v1077_v58, %v1076_v16  ;;  %v1117_v2 = vadd.f32 %v1116_v38, %v1115_v29  ;;  %v1159_v11 = vld [vmem:[%s2656_s7] sm:$0x1]  ;;  %v1163_v58 = vadd.f32 1e-08, %v1161_v10 }
 0x430   : > { %s1797_s11 = spop %1796  ;;  %v1185_v15 = vsub.f32 1.0, %v1159_v11 }
 0x431   : > { %v987_v19 = vrot.slane %v986_v17, 2  ;;  %v1079_v20 = vrot.slane %v1078_v18, 4  ;;  %v898_v21 = vstv %s1797_s11  ;;  %v1118_v54 = vrot.slane %v1117_v2, 1 }
 0x432   : > { %1846 = vrcp.f32 %v898_v21  ;;  %v1186_v16 = vadd.f32 1e-08, %v1185_v15 }
 0x433   : > { %v988_v36 = vadd.f32 %v987_v19, %v986_v17  ;;  %v1080_v22 = vadd.f32 %v1079_v20, %v1078_v18  ;;  %v1119_v55 = vadd.f32 %v1118_v54, %v1117_v2 }
 0x435   : > { %v1081_v24 = vrot.slane %v1080_v22, 2  ;;  %v989_v25 = vrot.slane %v988_v36, 1  ;;  %vm1120_vm0 = vcmp.gt.f32.partialorder %v1119_v55, 0.0 }
 0x436   : > { %v2583_v51 = vsel %vm1120_vm0, 1.0, %v1904_v37 }
 0x437   : > { %v1082_v26 = vadd.f32 %v1081_v24, %v1080_v22  ;;  %v990_v27 = vadd.f32 %v989_v25, %v988_v36  ;;  %v1123_v48 = vsub.f32 1.0, %v2583_v51 }
 0x439   : > { %v1083_v30 = vrot.slane %v1082_v26, 1  ;;  %v991_v39 = vmul.f32 %v2465_v50, %v990_v27  ;;  %v1143_v40 = vsel %vm1142_vm5, %v1123_v48, 0.0 }
 0x43b   : > { %v1084_v12 = vadd.f32 %v1083_v30, %v1082_v26  ;;  %992 = vst [vmem:[#allocation4] sm:$0x1] %v991_v39 }
 0x43d   : > { %v1085_v13 = vadd.f32 1e-08, %v1084_v12 }
 0x43f   : > { %v1847_v1 = vpop.eup %1846  ;;  %1848 = vlog2.f32 %v1085_v13 }
 0x440   : > { %1798 = vpush %v1847_v1  ;;  %1850 = vlog2.f32 %v1162_v14 }
 0x441   : > { %1852 = vlog2.f32 %v1163_v58 }
 0x442   : > { %1854 = vlog2.f32 %v1186_v16 }
 0x44c   : > { %v1849_v52 = vpop.eup %1848 }
 0x44d   : > { %v1087_v53 = vmul.f32 0.6931472, %v1849_v52  ;;  %v1851_v19 = vpop.eup %1850 }
 0x44e   : > { %v1853_v20 = vpop.eup %1852  ;;  %v1165_v36 = vmul.f32 0.6931472, %v1851_v19 }
 0x44f   : > { %v1088_v31 = vsub.f32 0.0, %v1087_v53  ;;  %v1855_v21 = vpop.eup %1854  ;;  %v1167_v22 = vmul.f32 0.6931472, %v1853_v20 }
 0x450   : > { %v1188_v23 = vmul.f32 0.6931472, %v1855_v21  ;;  %v1168_v24 = vsub.f32 0.0, %v1165_v36 }
 0x451   : > { %v1089_v32 = vmul.f32 %v1088_v31, %v991_v39  ;;  %v1169_v25 = vsub.f32 0.0, %v1167_v22 }
 0x452   : > { %v1189_v30 = vsub.f32 0.0, %v1188_v23 }
 0x453   : > { %v1091_v50 = vsel %vm1090_vm4, %v1089_v32, 0.0 }
 0x454   : > { %1092 = vadd.xlane.f32.xlu0 %v1091_v50 }
 0x458   : > { %1144 = vadd.xlane.f32.xlu0 %v1143_v40 }
 0x471   : > { %s2589_s12 = spop %1798 }
 0x472   : > { %1205 = sst [smem:[#allocation6 + $0x1]] %s2589_s12 }
 0x481   : > { %v1129_v41 = vpop.xlane.xlu1 %1128 }
 0x482   : > { %v1130_v34 = vrot.slane %v1129_v41, 4 }
 0x484   : > { %v1131_v42 = vadd.f32 %v1130_v34, %v1129_v41 }
 0x486   : > { %v1132_v37 = vrot.slane %v1131_v42, 2 }
 0x488   : > { %v1133_v33 = vadd.f32 %v1132_v37, %v1131_v42 }
 0x48a   : > { %v1134_v61 = vrot.slane %v1133_v33, 1 }
 0x48c   : > { %v1135_v4 = vadd.f32 %v1134_v61, %v1133_v33 }
 0x4dd   : > { %v1093_v43 = vpop.xlane.xlu0 %1092 }
 0x4de   : > { %v1094_v59 = vrot.slane %v1093_v43, 4 }
 0x4e0   : > { %v1095_v35 = vadd.f32 %v1094_v59, %v1093_v43 }
 0x4e1   : > { %v1145_v49 = vpop.xlane.xlu0 %1144 }
 0x4e2   : > { %v1096_v45 = vrot.slane %v1095_v35, 2  ;;  %v1146_v56 = vrot.slane %v1145_v49, 4 }
 0x4e4   : > { %v1147_v28 = vadd.f32 %v1146_v56, %v1145_v49  ;;  %v1097_v60 = vadd.f32 %v1096_v45, %v1095_v35 }
 0x4e6   : > { %v1148_v62 = vrot.slane %v1147_v28, 2  ;;  %v1098_v63 = vrot.slane %v1097_v60, 1 }
 0x4e8   : > { %v1099_v0 = vadd.f32 %v1098_v63, %v1097_v60  ;;  %v1149_v3 = vadd.f32 %v1148_v62, %v1147_v28 }
 0x4ea   : > { %1800 = vpush %v1099_v0  ;;  %v1150_v5 = vrot.slane %v1149_v3, 1 }
 0x4eb   : > { %1802 = vpush %v1135_v4 }
 0x4ec   : > { %v1151_v6 = vadd.f32 %v1150_v5, %v1149_v3 }
 0x4ee   : > { %1804 = vpush %v1151_v6 }
 0x51b   : > { %s2601_s23 = spop %1800 }
 0x51c   : > { %s1803_s24 = spop %1802  ;;  %s1101_s29 = smul.f32 %s2601_s23, %s2589_s12 }
 0x51d   : > { %s1137_s25 = sadd.f32 1e-08, %s1803_s24 }
 0x51f   : > { %v1138_v17 = vstv %s1137_s25  ;;  %s1805_s26 = spop %1804 }
 0x520   : > { %1856 = vrcp.f32 %v1138_v17  ;;  %s1153_s27 = sadd.f32 1e-08, %s1805_s26 }
 0x522   : > { %v1154_v18 = vstv %s1153_s27 }
 0x523   : > { %1858 = vrcp.f32 %v1154_v18 }
 0x52d   : > { %v1857_v26 = vpop.eup %1856 }
 0x52e   : > { %v1140_v27 = vmul.f32 %v1857_v26, %v1112_v46  ;;  %v1141_v29 = vmul.f32 %v1857_v26, %v1113_v57 }
 0x530   : > { %v1859_v39 = vpop.eup %1858  ;;  %v1170_v12 = vmul.f32 %v1168_v24, %v1140_v27  ;;  %v1171_v38 = vmul.f32 %v1169_v25, %v1141_v29 }
 0x531   : > { %v1156_v13 = vmul.f32 %v1859_v39, %v1123_v48 }
 0x532   : > { %v1172_v1 = vsel %vm1124_vm9, %v1170_v12, 0.0  ;;  %v1173_v2 = vsel %vm1124_vm9, %v1171_v38, 0.0 }
 0x533   : > { %v1174_v54 = vadd.f32 %v1173_v2, %v1172_v1  ;;  %v1190_v55 = vmul.f32 %v1189_v30, %v1156_v13 }
 0x535   : > { %1175 = vadd.xlane.f32.xlu1 %v1174_v54  ;;  %v1191_v44 = vsel %vm1142_vm5, %v1190_v55, 0.0 }
 0x536   : > { %1192 = vadd.xlane.f32.xlu0 %v1191_v44 }
 0x5be   : > { %v1176_v46 = vpop.xlane.xlu1 %1175 }
 0x5bf   : > { %v1177_v47 = vrot.slane %v1176_v46, 4  ;;  %v1193_v57 = vpop.xlane.xlu0 %1192 }
 0x5c0   : > { %v1194_v52 = vrot.slane %v1193_v57, 4 }
 0x5c1   : > { %v1178_v53 = vadd.f32 %v1177_v47, %v1176_v46 }
 0x5c2   : > { %v1195_v31 = vadd.f32 %v1194_v52, %v1193_v57 }
 0x5c3   : > { %v1179_v51 = vrot.slane %v1178_v53, 2 }
 0x5c4   : > { %v1196_v32 = vrot.slane %v1195_v31, 2 }
 0x5c5   : > { %v1180_v50 = vadd.f32 %v1179_v51, %v1178_v53 }
 0x5c6   : > { %v1197_v48 = vadd.f32 %v1196_v32, %v1195_v31 }
 0x5c7   : > { %v1181_v40 = vrot.slane %v1180_v50, 1 }
 0x5c8   : > { %v1198_v41 = vrot.slane %v1197_v48, 1 }
 0x5c9   : > { %v1182_v34 = vadd.f32 %v1181_v40, %v1180_v50 }
 0x5ca   : > { %v1199_v42 = vadd.f32 %v1198_v41, %v1197_v48 }
 0x5cb   : > { %1806 = vpush %v1182_v34 }
 0x5cc   : > { %1808 = vpush %v1199_v42 }
 0x5fc   : > { %s1807_s30 = spop %1806 }
 0x5fd   : > { %s1184_s11 = sadd.f32 %s1807_s30, %s1101_s29  ;;  %s1809_s16 = spop %1808 }
 0x5ff   : > { %s1201_s17 = sadd.f32 %s1809_s16, %s1184_s11 }
 0x601   : > { %1207 = sst [smem:[#allocation6 + $0x2]] %s1201_s17 }
 0x602 PF: > { %v1860_v37 = vld [vmem:[#allocation3] sm:$0xff]   ;;  %v1907_v43 = vmov 0.0   ;;  %v1861_v59 = vld [vmem:[%s1984_s20] sm:$0xff]   ;;  %vm1225_vm14 = vcmask 130048   ;;  %v1862_v35 = vld [vmem:[%s1984_s20 + $0x8] sm:$0xff]   ;;  %vm1908_vm7 = vmmov 0   ;;  %v1466_v34 = vlaneseq }
 0x603   : > { %1772 = vmatprep.subr.bf16.mxu0 %v1907_v43  ;;  %1778 = vmatprep.subr.bf16.mxu1 %v1907_v43  ;;  %v1863_v49 = vld [vmem:[%s1984_s20 + $0x10] sm:$0xff]   ;;  %v1864_v33 = vld [vmem:[%s1984_s20 + $0x18] sm:$0xff]   ;;  %v1210_v28 = vld [vmem:[#allocation2] sm:$0xff]  ;;  %vm1486_vm11 = vcmask 1043456   ;;  %s1676_s20 = sld [smem:[#allocation6 + $0x2]]  ;;  %p1823_p5 = scmp.eq.s32.totalorder %s1972_s14, 2 }
 0x604   : > { %1773 = vmatpush3.bf16.msra.mxu0 %v1860_v37  ;;  %1779 = vmatpush3.bf16.msra.mxu1 %v1860_v37  ;;  %v1211_v62 = vld [vmem:[#allocation2 + $0x8] sm:$0xff]  ;;  %v1467_v42 = vshrl.u32 %v1466_v34, 7  ;;  %s1909_s12 = smov [#allocation9]   ;;  %s1497_s19 = sld [smem:[#allocation6]] }
 0x605   : > { %1774 = vmatprep.mubr.msk.bf16.mxu0 %vm1908_vm7, %v1907_v43  ;;  %1780 = vmatprep.mubr.msk.bf16.mxu1 %vm1908_vm7, %v1907_v43  ;;  %s1675_s21 = sld [smem:[#allocation6 + $0x1]]  ;;  %s1910_s26 = smov [#allocation7]  }
 0x606   : > { %1784 = vmatprep.subr.bf16.mxu0 %v1907_v43  ;;  %1790 = vmatprep.subr.bf16.mxu1 %v1907_v43 }
 0x607   : > { %1775 = vmatmul.mubr.msk.bf16.vlgmr.msra.gmra.mxu0 %vm1225_vm14, %v1861_v59  ;;  %1781 = vmatmul.mubr.msk.bf16.vlgmr.msra.gmra.mxu1 %vm1225_vm14, %v1862_v35 }
 0x608   : > { %1785 = vmatpush3.bf16.msra.mxu0 %v1860_v37  ;;  %1791 = vmatpush3.bf16.msra.mxu1 %v1860_v37  ;;  %v1469_v37 = vstv %s1977_s15 }
 0x609   : > { %1786 = vmatprep.mubr.msk.bf16.mxu0 %vm1908_vm7, %v1907_v43  ;;  %1792 = vmatprep.mubr.msk.bf16.mxu1 %vm1908_vm7, %v1907_v43  ;;  %v1470_v59 = vadd.s32 %v1469_v37, %v1467_v42  ;;  %1814 = sst [smem:[#allocation9]] (%p1823_p5), %s1676_s20 }
 0x60a   : > { %1818 = dma.smem_to_hbm (%p1823_p5), %s1909_s12, 16, %s2659_s10, [#allocation10]  }
 0x60b   : > { %vm1476_vm8 = vcmp.lt.s32.totalorder %v1470_v59, 12 }
 0x60f   : > { %1787 = vmatmul.mubr.msk.bf16.vlgmr.msra.gmra.mxu0 %vm1225_vm14, %v1863_v49  ;;  %1793 = vmatmul.mubr.msk.bf16.vlgmr.msra.gmra.mxu1 %vm1225_vm14, %v1864_v33  ;;  %v1673_v49 = vld [vmem:[#allocation4] ss:$0 sm:$0xff] }
 0x6c7   : > { %v1263_v45 = vpop.f32.mrf.mxu0  ;;  %v1325_v56 = vpop.f32.mrf.mxu1 }
 0x6c8   : > { %v1270_v3 = vmul.f32 %v1263_v45, %v1210_v28  ;;  %v1332_v4 = vmul.f32 %v1325_v56, %v1210_v28 }
 0x6c9   : > { %v1776_v60 = vpop.f32.mrf.mxu0  ;;  %v1782_v61 = vpop.f32.mrf.mxu1 }
 0x6cb   : > { %v1266_v63 = vpop.f32.mrf.mxu0  ;;  %v1328_v0 = vpop.f32.mrf.mxu1 }
 0x6cc   : > { %v1271_v5 = vmul.f32 %v1266_v63, %v1211_v62  ;;  %v1333_v6 = vmul.f32 %v1328_v0, %v1211_v62 }
 0x6cd   : > { %v1777_v7 = vpop.f32.mrf.mxu0  ;;  %v1783_v8 = vpop.f32.mrf.mxu1 }
 0x6ce   : > { %v1272_v9 = vadd.f32 %v1271_v5, %v1270_v3  ;;  %v1334_v10 = vadd.f32 %v1333_v6, %v1332_v4 }
 0x6cf   : > { %v1387_v11 = vpop.f32.mrf.mxu0  ;;  %v1449_v14 = vpop.f32.mrf.mxu1 }
 0x6d0   : > { %v1273_v15 = vrot.slane %v1272_v9, 4  ;;  %v1335_v58 = vrot.slane %v1334_v10, 4  ;;  %v1394_v20 = vmul.f32 %v1387_v11, %v1210_v28  ;;  %v1456_v21 = vmul.f32 %v1449_v14, %v1210_v28 }
 0x6d1   : > { %v1788_v16 = vpop.f32.mrf.mxu0  ;;  %v1794_v17 = vpop.f32.mrf.mxu1 }
 0x6d2   : > { %v1274_v18 = vadd.f32 %v1273_v15, %v1272_v9  ;;  %v1336_v19 = vadd.f32 %v1335_v58, %v1334_v10 }
 0x6d3   : > { %v1390_v36 = vpop.f32.mrf.mxu0  ;;  %v1452_v22 = vpop.f32.mrf.mxu1 }
 0x6d4   : > { %v1275_v23 = vrot.slane %v1274_v18, 2  ;;  %v1337_v24 = vrot.slane %v1336_v19, 2  ;;  %v1395_v25 = vmul.f32 %v1390_v36, %v1211_v62  ;;  %v1457_v26 = vmul.f32 %v1452_v22, %v1211_v62 }
 0x6d5   : > { %v1789_v27 = vpop.f32.mrf.mxu0  ;;  %v1795_v29 = vpop.f32.mrf.mxu1 }
 0x6d6   : > { %v1276_v30 = vadd.f32 %v1275_v23, %v1274_v18  ;;  %v1338_v39 = vadd.f32 %v1337_v24, %v1336_v19  ;;  %v1396_v12 = vadd.f32 %v1395_v25, %v1394_v20  ;;  %v1458_v38 = vadd.f32 %v1457_v26, %v1456_v21 }
 0x6d8   : > { %v1277_v13 = vrot.slane %v1276_v30, 1  ;;  %v1339_v1 = vrot.slane %v1338_v39, 1  ;;  %v1397_v2 = vrot.slane %v1396_v12, 4  ;;  %v1459_v54 = vrot.slane %v1458_v38, 4 }
 0x6da   : > { %v1278_v55 = vadd.f32 %v1277_v13, %v1276_v30  ;;  %v1340_v44 = vadd.f32 %v1339_v1, %v1338_v39  ;;  %v1398_v46 = vadd.f32 %v1397_v2, %v1396_v12  ;;  %v1460_v47 = vadd.f32 %v1459_v54, %v1458_v38 }
 0x6dc   : > { %1279 = vst [vmem:[#allocation5] sm:$0x1] %v1278_v55  ;;  %1341 = vst [vmem:[#allocation5 + $0x1] sm:$0x1] %v1340_v44  ;;  %v1399_v57 = vrot.slane %v1398_v46, 2  ;;  %v1461_v52 = vrot.slane %v1460_v47, 2 }
 0x6de   : > { %v1400_v53 = vadd.f32 %v1399_v57, %v1398_v46  ;;  %v1462_v31 = vadd.f32 %v1461_v52, %v1460_v47 }
 0x6e0   : > { %v1401_v51 = vrot.slane %v1400_v53, 1  ;;  %v1463_v32 = vrot.slane %v1462_v31, 1 }
 0x6e2   : > { %v1402_v50 = vadd.f32 %v1401_v51, %v1400_v53  ;;  %v1464_v48 = vadd.f32 %v1463_v32, %v1462_v31 }
 0x6e4   : > { %1403 = vst [vmem:[#allocation5 + $0x2] sm:$0x1] %v1402_v50  ;;  %1465 = vst [vmem:[#allocation5 + $0x3] sm:$0x1] %v1464_v48 }
 0x6eb   : > { %v1471_v40 = vld [vmem:[#allocation5] sm:$0xf] }
 0x6ec   : > { %v1472_v41 = vadd.f32 1e-08, %v1471_v40 }
 0x6ee   : > { %1865 = vlog2.f32 %v1472_v41 }
 0x6fb   : > { %v1866_v43 = vpop.eup %1865 }
 0x6fc   : > { %v1474_v35 = vmul.f32 0.6931472, %v1866_v43 }
 0x6fe   : > { %v1475_v33 = vsub.f32 0.0, %v1474_v35 }
 0x700   : > { %v1484_v45 = vmul.f32 %v1673_v49, %v1475_v33 }
 0x702   : > { %v1485_v56 = vsel %vm1476_vm8, %v1484_v45, 0.0 }
 0x703   : > { %v1487_v28 = vsel %vm1486_vm11, %v1485_v56, 0.0 }
 0x704   : > { %1488 = vadd.xlane.f32.xlu0 %v1487_v28 }
 0x78d   : > { %v1489_v60 = vpop.xlane.xlu0 %1488 }
 0x78e   : > { %v1490_v61 = vrot.slane %v1489_v60, 4 }
 0x790   : > { %v1491_v62 = vadd.f32 %v1490_v61, %v1489_v60 }
 0x792   : > { %v1492_v63 = vrot.slane %v1491_v62, 2 }
 0x794   : > { %v1493_v0 = vadd.f32 %v1492_v63, %v1491_v62 }
 0x796   : > { %v1494_v3 = vrot.slane %v1493_v0, 1 }
 0x798   : > { %v1495_v4 = vadd.f32 %v1494_v3, %v1493_v0 }
 0x79a   : > { %1810 = vpush %v1495_v4 }
 0x7cb   : > { %s1811_s22 = spop %1810 }
 0x7cc   : > { %s1498_s23 = sadd.f32 %s1811_s22, %s1497_s19 }
 0x7ce   : > { %1500 = sst [smem:[#allocation6]] %s1498_s23  ;;  %s1507_s24 = smul.f32 %s1675_s21, %s1498_s23 }
 0x7d0   : > { %s1508_s25 = smul.f32 0.083333336, %s1507_s24 }
 0x7d2   : > { %1813 = sst [smem:[#allocation7]] (%p1823_p5), %s1508_s25 }
 0x7d3   : > { %1816 = dma.smem_to_hbm (%p1823_p5), %s1910_s26, 16, %s2658_s9, [#allocation8]  }
 0x7d4   : > { %1892 = dma.done.wait (%p1823_p5), [#allocation8], 16  }
 0x7d5   : > { %1894 = vsyncadd (%p1823_p5), [#allocation8], 4294967280 }
 0x7d6   : > { %1896 = dma.done.wait (%p1823_p5), [#allocation10], 16  }
 0x7d7   : > { %1898 = vsyncadd (%p1823_p5), [#allocation10], 4294967280 }
 0x7d8   : > { %1540 = sfence }
 0x7d9 PF: > { %s23_s13 = sadd.s32 1, %s1901_s13  }
 0x7da   : > { %p20_p6 = scmp.ge.s32.totalorder %s23_s13, 5  }
 0x7dc   :  { %22 = sbr.rel (!%p20_p6) target bundleno = 2 (0x2), region = 108 }
 0x7e1   :  { %1546 = vsyncpa [#allocation8], 1 }
 0x7e2   :  { %1548 = vsyncpa [#allocation8 + $0x1], 1 }
 0x7e3   :  { %1549 = vsyncpa [#allocation10], 1 }

</bundles_post_ra>
